<compile_context>
chip_gen: v7x
topology: tpu7x:2x2x1
jax: 0.10.0
libtpu: 0.0.40
codegen_flags: <defaults>
</compile_context>

<pallas_src>
import functools
import numpy as np
import jax
import jax.numpy as jnp
from jax.experimental import pallas as pl
from jax.experimental.pallas import tpu as pltpu

# ---------------- config (small, consistent with the module) ----------------
B = 2                 # batch
T = 8                 # sequence length (<= max_seq_len)
VOCAB = 40            # n_src_vocab = len(symbols) + 1
D_MODEL = 32          # encoder_hidden
N_HEAD = 2            # encoder_head
D_K = D_MODEL // N_HEAD
D_V = D_MODEL // N_HEAD
N_LAYERS = 2          # encoder_layer
IN_CH = 8             # enc_ffn_in_ch_size  (d_hid1)
OUT_CH = 8            # enc_ffn_out_ch_size (d_hid2)
KER = 9               # enc_ffn_style_conv1d_kernel_size
P = (KER - 1) // 2
STYLE_DIM = 16        # style_vector_dim
D_OUT = 32            # decoder_hidden
MAX_SEQ_LEN = 16
LN_EPS = 1e-5
NEG_INF = -1e9
SCALE = 1.0 / float(np.sqrt(D_K))
HIGHLOW = "low"       # config.highlow -> SCPositionwiseFeedForward_low
RETURN_ATTN = True    # attention-map output is optional (review item)

CONV3_SHIFTS = (-1, 0, 1)
DW_SHIFTS = tuple(range(-P, P + 1))


def _r8(n):
    return ((n + 7) // 8) * 8


def _mish(x):
    # mish(x) = x * tanh(softplus(x)), numerically stable softplus
    sp = jnp.log(1.0 + jnp.exp(-jnp.abs(x))) + jnp.maximum(x, 0.0)
    return x * jnp.tanh(sp)


# =========================== weight slab layout (static) ===========================

W_WIDTH = 128  # lane-aligned slab width


def build_weight_layout():
    layout = {}
    n = 0

    def add(name, r, c):
        nonlocal n
        layout[name] = (n, r, c)
        n += _r8(r)                      # sublane-aligned entries

    add('pos', T, D_MODEL)
    add('mask3', T, 3 * D_MODEL)         # static edge mask for the k=3 prenet convs
    add('mask9', T, KER * IN_CH)         # static edge mask for the k=9 depthwise conv
    add('c1w', 3 * D_MODEL, D_MODEL); add('c1b', 1, D_MODEL)
    add('c2w', 3 * D_MODEL, D_MODEL); add('c2b', 1, D_MODEL)
    add('fcw', D_MODEL, D_MODEL);     add('fcb', 1, D_MODEL)
    for l in range(N_LAYERS):
        add(f'wqkv{l}', D_MODEL, 3 * D_MODEL); add(f'bqkv{l}', 1, 3 * D_MODEL)
        add(f'wo{l}', D_MODEL, D_MODEL);       add(f'bo{l}', 1, D_MODEL)
        add(f'ln0g{l}', 1, D_MODEL);           add(f'ln0b{l}', 1, D_MODEL)
        add(f'w1{l}', D_MODEL, IN_CH);         add(f'b1{l}', 1, IN_CH)
        add(f'w2{l}', OUT_CH, D_MODEL);        add(f'b2{l}', 1, D_MODEL)
        add(f'ln1g{l}', 1, D_MODEL);           add(f'ln1b{l}', 1, D_MODEL)
    add('fow', D_MODEL, D_OUT); add('fob', 1, D_OUT)
    return layout, n


W_LAYOUT, W_ROWS = build_weight_layout()

# per-batch style slab layout (rows x STYLE_W), 8-row aligned entries
STYLE_W = max(T, IN_CH, OUT_CH)
SB_KEEP = 0
SB_MADD = _r8(T)
SB_LAYER0 = SB_MADD + 8
SB_DB_OFF = _r8(KER * IN_CH)
SB_PW_OFF = SB_DB_OFF + 8
SB_PB_OFF = SB_PW_OFF + _r8(IN_CH)
SB_LAYER_STRIDE = SB_PB_OFF + 8
R_STYLE = SB_LAYER0 + N_LAYERS * SB_LAYER_STRIDE


def shift_mask(n_rows, shifts, width):
    """mask[t, j*width + c] = 1 iff 0 <= t + shifts[j] < n_rows (SAME-pad validity)."""
    m = np.zeros((n_rows, len(shifts) * width), np.float32)
    for j, s in enumerate(shifts):
        lo, hi = max(0, -s), min(n_rows, n_rows - s)
        m[lo:hi, j * width:(j + 1) * width] = 1.0
    return m


# =========================== fused Pallas kernel ===========================

def make_encoder_kernel(wl, return_attn):
    def kernel(x_ref, sb_ref, w_ref, out_ref):
        def rd(name):
            off, r, c = wl[name]
            return w_ref[off:off + r, 0:c]                     # static slice -> free

        def mdot(a, b):                                        # MXU, bf16 in / f32 acc
            return jnp.dot(a.astype(jnp.bfloat16), b.astype(jnp.bfloat16),
                           preferred_element_type=jnp.float32)

        def mdot_nt(a, b):                                     # a @ b.T without transpose
            return jax.lax.dot_general(
                a.astype(jnp.bfloat16), b.astype(jnp.bfloat16),
                (((1,), (1,)), ((), ())), preferred_element_type=jnp.float32)

        def layer_norm(h, g, b):
            mu = jnp.mean(h, axis=-1, keepdims=True)
            var = jnp.mean((h - mu) ** 2, axis=-1, keepdims=True)
            return (h - mu) * jax.lax.rsqrt(var + LN_EPS) * g + b

        def shift_stack(h, shifts, mask):
            """stack[t, j*C + c] = h[t + shifts[j], c] (zero outside [0,T))."""
            cache = {0: h}
            parts = []
            for s in shifts:
                r = (-s) % T
                if r not in cache:
                    cache[r] = pltpu.roll(h, shift=r, axis=0)  # XLU sublane rotate
                parts.append(cache[r])
            return jnp.concatenate(parts, axis=-1) * mask

        x = x_ref[...]                                         # (T, D) embedded tokens
        keep = sb_ref[SB_KEEP:SB_KEEP + T, 0:1]                # (T, 1) 1 valid / 0 pad
        madd = sb_ref[SB_MADD:SB_MADD + 1, 0:T]                # (1, T) additive key mask
        mask3 = rd('mask3')                                    # (T, 3D) conv3 edge mask
        mask9 = rd('mask9')                                    # (T, KER*C) dw edge mask

        # -------- Prenet (+ residual, masked_fill) + positional encoding --------
        h = _mish(mdot(shift_stack(x, CONV3_SHIFTS, mask3), rd('c1w')) + rd('c1b'))
        h = _mish(mdot(shift_stack(h, CONV3_SHIFTS, mask3), rd('c2w')) + rd('c2b'))
        pre = mdot(h, rd('fcw')) + rd('fcb') + x
        enc = pre * keep + rd('pos')

        # -------- N_LAYERS x SCFFTBlock (static unrolled) --------
        for l in range(N_LAYERS):
            # --- multi-head self-attention (+ residual) -> ln_0 -> masked_fill ---
            qkv = mdot(enc, rd(f'wqkv{l}')) + rd(f'bqkv{l}')   # (T, 3D)
            wo = rd(f'wo{l}')                                  # (D, D)
            att = rd(f'bo{l}') + enc                           # bias + residual accum
            for hh in range(N_HEAD):                           # static head loop
                qh = qkv[:, hh * D_K:(hh + 1) * D_K]
                kh = qkv[:, D_MODEL + hh * D_K:D_MODEL + (hh + 1) * D_K]
                vh = qkv[:, 2 * D_MODEL + hh * D_V:2 * D_MODEL + (hh + 1) * D_V]
                s = mdot_nt(qh, kh) * SCALE + madd             # (T, T)
                e = jnp.exp(s - jnp.max(s, axis=-1, keepdims=True))
                a = e * pl.reciprocal(jnp.sum(e, axis=-1, keepdims=True), approx=True)
                if return_attn:                                # direct per-head write
                    c0 = D_OUT + (l * N_HEAD + hh) * T
                    out_ref[:, c0:c0 + T] = a
                ctx = mdot(a, vh)                              # (T, D_V)
                att = att + mdot(ctx, wo[hh * D_V:(hh + 1) * D_V, :])
            att = layer_norm(att, rd(f'ln0g{l}'), rd(f'ln0b{l}')) * keep

            # --- SCPositionwiseFeedForward_low (+ residual) -> ln_1 -> masked_fill ---
            sbase = SB_LAYER0 + l * SB_LAYER_STRIDE
            dmat = sb_ref[sbase:sbase + KER * IN_CH, 0:IN_CH]              # (KER*C, C)
            dbias = sb_ref[sbase + SB_DB_OFF:sbase + SB_DB_OFF + 1, 0:IN_CH]
            pwn = sb_ref[sbase + SB_PW_OFF:sbase + SB_PW_OFF + IN_CH, 0:OUT_CH]
            pbias = sb_ref[sbase + SB_PB_OFF:sbase + SB_PB_OFF + 1, 0:OUT_CH]

            h1 = _mish(mdot(att, rd(f'w1{l}')) + rd(f'b1{l}'))             # (T, C)
            # depthwise conv as ONE MXU matmul on the shifted lane-stack
            conv = mdot(shift_stack(h1, DW_SHIFTS, mask9), dmat) + dbias   # (T, C)
            y = mdot(conv, pwn) + pbias                                    # pointwise
            ffn = mdot(y, rd(f'w2{l}')) + rd(f'b2{l}') + att               # w_2 + resid
            enc = layer_norm(ffn, rd(f'ln1g{l}'), rd(f'ln1b{l}')) * keep

        # -------- fc_out --------
        out_ref[:, 0:D_OUT] = mdot(enc, rd('fow')) + rd('fob')
    return kernel


def encoder_fused(x_emb, style_slab, w_slab, return_attn):
    out_w = D_OUT + (N_LAYERS * N_HEAD * T if return_attn else 0)
    return pl.pallas_call(
        make_encoder_kernel(W_LAYOUT, return_attn),
        grid=(B,),
        in_specs=[
            pl.BlockSpec((None, T, D_MODEL), lambda b: (b, 0, 0)),
            pl.BlockSpec((None, R_STYLE, STYLE_W), lambda b: (b, 0, 0)),
            pl.BlockSpec((W_ROWS, W_WIDTH), lambda b: (0, 0)),
        ],
        out_specs=pl.BlockSpec((None, T, out_w), lambda b: (b, 0, 0)),
        out_shape=jax.ShapeDtypeStruct((B, T, out_w), jnp.float32),
        compiler_params=pltpu.CompilerParams(dimension_semantics=("parallel",)),
    )(x_emb, style_slab, w_slab)


# =========================== parameters & glue ===========================

def get_sinusoid_encoding_table(n_position, d_hid):
    pos = np.arange(n_position)[:, None].astype(np.float64)
    i = np.arange(d_hid)[None, :].astype(np.float64)
    angle = pos / np.power(10000.0, 2.0 * (i // 2) / d_hid)
    table = np.zeros((n_position, d_hid))
    table[:, 0::2] = np.sin(angle[:, 0::2])
    table[:, 1::2] = np.cos(angle[:, 1::2])
    return jnp.asarray(table, dtype=jnp.float32)


def init_params(key):
    keys = iter(jax.random.split(key, 64))

    def nrm(shape, scale=0.1):
        return (scale * jax.random.normal(next(keys), shape)).astype(jnp.float32)

    params = {}
    emb = nrm((VOCAB, D_MODEL))
    params['emb'] = emb.at[0].set(0.0)                     # padding_idx = 0

    # Prenet. c*w row block [k*D:(k+1)*D, :] corresponds to torch conv weight[:, :, k].T
    params['prenet'] = dict(
        c1w=nrm((3 * D_MODEL, D_MODEL)), c1b=nrm((1, D_MODEL)),
        c2w=nrm((3 * D_MODEL, D_MODEL)), c2b=nrm((1, D_MODEL)),
        fcw=nrm((D_MODEL, D_MODEL)),     fcb=nrm((1, D_MODEL)),
    )
    params['pos'] = get_sinusoid_encoding_table(MAX_SEQ_LEN + 1, D_MODEL)

    L = N_LAYERS
    params['layers'] = dict(
        # wqkv = [Wq | Wk | Wv] stacked along the output axis (right-multiply layout)
        wqkv=nrm((L, D_MODEL, 3 * D_MODEL)), bqkv=nrm((L, 1, 3 * D_MODEL)),
        wo=nrm((L, D_MODEL, D_MODEL)),       bo=nrm((L, 1, D_MODEL)),
        ln0_g=jnp.ones((L, 1, D_MODEL), jnp.float32),
        ln0_b=jnp.zeros((L, 1, D_MODEL), jnp.float32),
        w1=nrm((L, D_MODEL, IN_CH)),         b1=nrm((L, 1, IN_CH)),
        w2=nrm((L, OUT_CH, D_MODEL)),        b2=nrm((L, 1, D_MODEL)),
        ln1_g=jnp.ones((L, 1, D_MODEL), jnp.float32),
        ln1_b=jnp.zeros((L, 1, D_MODEL), jnp.float32),
    )
    total = N_LAYERS * (KER * IN_CH + IN_CH + IN_CH + IN_CH * OUT_CH + OUT_CH + OUT_CH)
    params['kp_w'] = nrm((STYLE_DIM, total))
    params['kp_b'] = nrm((1, total))
    params['fout_w'] = nrm((D_MODEL, D_OUT))
    params['fout_b'] = nrm((1, D_OUT))
    return params


def pack_weights(params):
    """One-time host packing of all shared weights (+ static masks) into one slab."""
    slab = np.zeros((W_ROWS, W_WIDTH), np.float32)

    def put(name, arr):
        off, r, c = W_LAYOUT[name]
        slab[off:off + r, 0:c] = np.asarray(arr, np.float32).reshape(r, c)

    put('pos', params['pos'][:T])
    put('mask3', shift_mask(T, CONV3_SHIFTS, D_MODEL))
    put('mask9', shift_mask(T, DW_SHIFTS, IN_CH))
    pn = params['prenet']
    put('c1w', pn['c1w']); put('c1b', pn['c1b'])
    put('c2w', pn['c2w']); put('c2b', pn['c2b'])
    put('fcw', pn['fcw']); put('fcb', pn['fcb'])
    ly = params['layers']
    for l in range(N_LAYERS):
        put(f'wqkv{l}', ly['wqkv'][l]); put(f'bqkv{l}', ly['bqkv'][l])
        put(f'wo{l}', ly['wo'][l]);     put(f'bo{l}', ly['bo'][l])
        put(f'ln0g{l}', ly['ln0_g'][l]); put(f'ln0b{l}', ly['ln0_b'][l])
        put(f'w1{l}', ly['w1'][l]);     put(f'b1{l}', ly['b1'][l])
        put(f'w2{l}', ly['w2'][l]);     put(f'b2{l}', ly['b2'][l])
        put(f'ln1g{l}', ly['ln1_g'][l]); put(f'ln1b{l}', ly['ln1_b'][l])
    put('fow', params['fout_w']); put('fob', params['fout_b'])
    return jnp.asarray(slab)


def _pad_block(a, rows, width):
    return jnp.pad(a, ((0, 0), (0, rows - a.shape[1]), (0, width - a.shape[2])))


@functools.partial(jax.jit, static_argnames=("return_attn",))
def encoder_forward(params, w_slab, src_seq, style_vector, mask, return_attn=RETURN_ATTN):
    maskf = mask.astype(jnp.float32)
    keep = (1.0 - maskf)[:, :, None]                        # (B, T, 1), 1.0 = valid
    madd = (maskf * jnp.float32(NEG_INF))[:, None, :]       # (B, 1, T), additive key mask

    # embedding lookup (XLA glue)
    src_embedded = jnp.take(params['emb'], src_seq, axis=0)            # (B, T, D)

    # KernelPredictor: tiny linear -> plain XLA (no Pallas launch needed)
    kp = jnp.dot(style_vector, params['kp_w']) + params['kp_b']
    sizes = [N_LAYERS * KER * IN_CH, N_LAYERS * IN_CH, N_LAYERS * IN_CH,
             N_LAYERS * IN_CH * OUT_CH, N_LAYERS * OUT_CH, N_LAYERS * OUT_CH]
    splits = list(np.cumsum(sizes)[:-1])
    d_w, d_g, d_b, p_w, p_g, p_b = jnp.split(kp, splits, axis=1)
    d_w = d_w.reshape(B, N_LAYERS, IN_CH, KER)      # torch view (B, L, in, 1, K) squeezed
    d_g = d_g.reshape(B, N_LAYERS, IN_CH)
    d_b = d_b.reshape(B, N_LAYERS, IN_CH)
    p_w = p_w.reshape(B, N_LAYERS, OUT_CH, IN_CH)   # torch view (B, L, out, in, 1) squeezed
    p_g = p_g.reshape(B, N_LAYERS, OUT_CH)
    p_b = p_b.reshape(B, N_LAYERS, OUT_CH)

    # F.normalize(dim=1 -> channel axis) + gain, hoisted out of the kernel.
    d_norm = jnp.maximum(jnp.sqrt(jnp.sum(d_w * d_w, axis=2, keepdims=True)), 1e-12)
    dwn = d_w / d_norm * d_g[:, :, :, None]
    # NOTE: faithful to the reference 'low' branch einsum, which sums over the expanded
    # (T identical copies) broadcast axis -> extra factor T, folded into the weights here.
    dwn = jnp.transpose(dwn * jnp.float32(T), (0, 1, 3, 2))             # (B, L, KER, C)
    # block-sparse depthwise matrix: dmat[b,l,k*C+c,c] = dwn[b,l,k,c]
    dmat = (dwn[..., None] * jnp.eye(IN_CH, dtype=jnp.float32)
            ).reshape(B, N_LAYERS, KER * IN_CH, IN_CH)
    p_norm = jnp.maximum(jnp.sqrt(jnp.sum(p_w * p_w, axis=2, keepdims=True)), 1e-12)
    pwn = p_w / p_norm * p_g[:, :, :, None]                             # (B, L, OUT, IN)
    dbias = d_b[:, :, None, :]                                          # (B, L, 1, C)
    pbias = p_b[:, :, None, :]                                          # (B, L, 1, C)

    # pack all per-batch data into ONE (B, R_STYLE, STYLE_W) slab (single DMA per step)
    blocks = [_pad_block(keep, _r8(T), STYLE_W),
              _pad_block(madd, 8, STYLE_W)]
    for l in range(N_LAYERS):
        blocks += [_pad_block(dmat[:, l], _r8(KER * IN_CH), STYLE_W),
                   _pad_block(dbias[:, l], 8, STYLE_W),
                   _pad_block(pwn[:, l], _r8(IN_CH), STYLE_W),
                   _pad_block(pbias[:, l], 8, STYLE_W)]
    style_slab = jnp.concatenate(blocks, axis=1)                        # (B, R_STYLE, 8)

    packed = encoder_fused(src_embedded, style_slab, w_slab, return_attn)
    enc_out = packed[:, :, :D_OUT]
    slf_attn = []
    if return_attn:
        att = packed[:, :, D_OUT:].reshape(B, T, N_LAYERS, N_HEAD, T)
        att = jnp.transpose(att, (0, 2, 3, 1, 4))                       # (B, L, H, T, T)
        slf_attn = [att[:, l] for l in range(N_LAYERS)]
    return enc_out, src_embedded, slf_attn


# =========================== main ===========================

if __name__ == "__main__":
    key = jax.random.PRNGKey(0)
    kparam, kseq, kstyle = jax.random.split(key, 3)
    params = init_params(kparam)
    w_slab = pack_weights(params)

    lengths = jnp.array([T, T - 2], dtype=jnp.int32)
    mask = jnp.arange(T)[None, :] >= lengths[:, None]       # (B, T) True = pad
    src_seq = jax.random.randint(kseq, (B, T), 1, VOCAB, dtype=jnp.int32)
    src_seq = jnp.where(mask, 0, src_seq)
    style_vector = jax.random.normal(kstyle, (B, STYLE_DIM), dtype=jnp.float32)

    enc_out, src_emb, attns = encoder_forward(params, w_slab, src_seq, style_vector, mask)
    jax.block_until_ready(enc_out)
    jax.block_until_ready(src_emb)
    for a in attns:
        jax.block_until_ready(a)
    # TODO(synk): Dropout layers are eval-mode identity; training-mode stochastic dropout
    # and the log_debug file logging of the reference are not implemented.
    print("KERNEL_OK")
</pallas_src>

<mosaic_0001>
module attributes {stable_mosaic.version = 11 : i64} {
  func.func @kernel(%arg0: i32, %arg1: memref<1x8x32xf32, #tpu.memory_space<vmem>>, %arg2: memref<1x208x8xf32, #tpu.memory_space<vmem>>, %arg3: memref<648x128xf32, #tpu.memory_space<vmem>>, %arg4: memref<1x8x64xf32, #tpu.memory_space<vmem>>) attributes {dimension_semantics = [#tpu.dimension_semantics<parallel>], iteration_bounds = array<i64: 2>, scalar_prefetch = 0 : i64, scratch_operands = 0 : i64, tpu.core_type = #tpu.core_type<tc>, window_params = [{transform_indices = @transform_0, window_bounds = array<i64: 1, 8, 32>}, {transform_indices = @transform_1, window_bounds = array<i64: 1, 208, 8>}, {pipeline_mode = #tpu.pipeline_mode<synchronous>, transform_indices = @transform_2, window_bounds = array<i64: 648, 128>}, {transform_indices = @transform_3, window_bounds = array<i64: 1, 8, 64>}]} {
    %c0 = arith.constant 0 : index
    %c0_0 = arith.constant 0 : index
    %c0_1 = arith.constant 0 : index
    %0 = vector.load %arg1[%c0, %c0_0, %c0_1] : memref<1x8x32xf32, #tpu.memory_space<vmem>>, vector<1x8x32xf32>
    %1 = vector.shape_cast %0 : vector<1x8x32xf32> to vector<8x32xf32>
    %c0_2 = arith.constant 0 : index
    %c0_3 = arith.constant 0 : index
    %c0_4 = arith.constant 0 : index
    %2 = vector.load %arg2[%c0_2, %c0_3, %c0_4] : memref<1x208x8xf32, #tpu.memory_space<vmem>>, vector<1x8x1xf32>
    %3 = vector.shape_cast %2 : vector<1x8x1xf32> to vector<8x1xf32>
    %c0_5 = arith.constant 0 : index
    %c8 = arith.constant 8 : index
    %c0_6 = arith.constant 0 : index
    %4 = vector.load %arg2[%c0_5, %c8, %c0_6] : memref<1x208x8xf32, #tpu.memory_space<vmem>>, vector<1x1x8xf32>
    %5 = vector.shape_cast %4 : vector<1x1x8xf32> to vector<1x8xf32>
    %c8_7 = arith.constant 8 : index
    %c0_8 = arith.constant 0 : index
    %6 = vector.load %arg3[%c8_7, %c0_8] : memref<648x128xf32, #tpu.memory_space<vmem>>, vector<8x96xf32>
    %c16 = arith.constant 16 : index
    %c0_9 = arith.constant 0 : index
    %7 = vector.load %arg3[%c16, %c0_9] : memref<648x128xf32, #tpu.memory_space<vmem>>, vector<8x72xf32>
    %c1_i32 = arith.constant 1 : i32
    %8 = tpu.dynamic_rotate %1 by %c1_i32 dim 0 : vector<8x32xf32>, i32 -> vector<8x32xf32>
    %c7_i32 = arith.constant 7 : i32
    %9 = tpu.dynamic_rotate %1 by %c7_i32 dim 0 : vector<8x32xf32>, i32 -> vector<8x32xf32>
    %10 = tpu.concatenate %8, %1, %9 in 1 : vector<8x32xf32>, vector<8x32xf32>, vector<8x32xf32> -> vector<8x96xf32>
    %11 = arith.mulf %10, %6 : vector<8x96xf32>
    %c24 = arith.constant 24 : index
    %c0_10 = arith.constant 0 : index
    %12 = vector.load %arg3[%c24, %c0_10] : memref<648x128xf32, #tpu.memory_space<vmem>>, vector<96x32xf32>
    %13 = arith.truncf %11 : vector<8x96xf32> to vector<8x96xbf16>
    %14 = arith.truncf %12 : vector<96x32xf32> to vector<96x32xbf16>
    %cst = arith.constant dense<0.000000e+00> : vector<8x32xf32>
    %15 = tpu.matmul %13, %14, %cst {dimension_numbers = #tpu.dot_dimension_numbers<[1], [0], [0], [1], [0, 0, 1, 1], [], []>} : vector<8x96xbf16>, vector<96x32xbf16>, vector<8x32xf32> -> vector<8x32xf32>
    %c120 = arith.constant 120 : index
    %c0_11 = arith.constant 0 : index
    %16 = vector.load %arg3[%c120, %c0_11] : memref<648x128xf32, #tpu.memory_space<vmem>>, vector<1x32xf32>
    %17 = vector.broadcast %16 : vector<1x32xf32> to vector<8x32xf32>
    %18 = arith.addf %15, %17 : vector<8x32xf32>
    %19 = math.absf %18 : vector<8x32xf32>
    %cst_12 = arith.constant 0.000000e+00 : f32
    %20 = vector.broadcast %cst_12 : f32 to vector<8x32xf32>
    %21 = arith.subf %20, %19 : vector<8x32xf32>
    %22 = math.exp %21 : vector<8x32xf32>
    %cst_13 = arith.constant 1.000000e+00 : f32
    %23 = vector.broadcast %cst_13 : f32 to vector<8x32xf32>
    %24 = arith.addf %23, %22 : vector<8x32xf32>
    %25 = math.log %24 : vector<8x32xf32>
    %cst_14 = arith.constant 0.000000e+00 : f32
    %26 = vector.broadcast %cst_14 : f32 to vector<8x32xf32>
    %27 = arith.maximumf %18, %26 : vector<8x32xf32>
    %28 = arith.addf %25, %27 : vector<8x32xf32>
    %29 = math.tanh %28 : vector<8x32xf32>
    %30 = arith.mulf %18, %29 : vector<8x32xf32>
    %c1_i32_15 = arith.constant 1 : i32
    %31 = tpu.dynamic_rotate %30 by %c1_i32_15 dim 0 : vector<8x32xf32>, i32 -> vector<8x32xf32>
    %c7_i32_16 = arith.constant 7 : i32
    %32 = tpu.dynamic_rotate %30 by %c7_i32_16 dim 0 : vector<8x32xf32>, i32 -> vector<8x32xf32>
    %33 = tpu.concatenate %31, %30, %32 in 1 : vector<8x32xf32>, vector<8x32xf32>, vector<8x32xf32> -> vector<8x96xf32>
    %34 = arith.mulf %33, %6 : vector<8x96xf32>
    %c128 = arith.constant 128 : index
    %c0_17 = arith.constant 0 : index
    %35 = vector.load %arg3[%c128, %c0_17] : memref<648x128xf32, #tpu.memory_space<vmem>>, vector<96x32xf32>
    %36 = arith.truncf %34 : vector<8x96xf32> to vector<8x96xbf16>
    %37 = arith.truncf %35 : vector<96x32xf32> to vector<96x32xbf16>
    %cst_18 = arith.constant dense<0.000000e+00> : vector<8x32xf32>
    %38 = tpu.matmul %36, %37, %cst_18 {dimension_numbers = #tpu.dot_dimension_numbers<[1], [0], [0], [1], [0, 0, 1, 1], [], []>} : vector<8x96xbf16>, vector<96x32xbf16>, vector<8x32xf32> -> vector<8x32xf32>
    %c224 = arith.constant 224 : index
    %c0_19 = arith.constant 0 : index
    %39 = vector.load %arg3[%c224, %c0_19] : memref<648x128xf32, #tpu.memory_space<vmem>>, vector<1x32xf32>
    %40 = vector.broadcast %39 : vector<1x32xf32> to vector<8x32xf32>
    %41 = arith.addf %38, %40 : vector<8x32xf32>
    %42 = math.absf %41 : vector<8x32xf32>
    %cst_20 = arith.constant 0.000000e+00 : f32
    %43 = vector.broadcast %cst_20 : f32 to vector<8x32xf32>
    %44 = arith.subf %43, %42 : vector<8x32xf32>
    %45 = math.exp %44 : vector<8x32xf32>
    %cst_21 = arith.constant 1.000000e+00 : f32
    %46 = vector.broadcast %cst_21 : f32 to vector<8x32xf32>
    %47 = arith.addf %46, %45 : vector<8x32xf32>
    %48 = math.log %47 : vector<8x32xf32>
    %cst_22 = arith.constant 0.000000e+00 : f32
    %49 = vector.broadcast %cst_22 : f32 to vector<8x32xf32>
    %50 = arith.maximumf %41, %49 : vector<8x32xf32>
    %51 = arith.addf %48, %50 : vector<8x32xf32>
    %52 = math.tanh %51 : vector<8x32xf32>
    %53 = arith.mulf %41, %52 : vector<8x32xf32>
    %c232 = arith.constant 232 : index
    %c0_23 = arith.constant 0 : index
    %54 = vector.load %arg3[%c232, %c0_23] : memref<648x128xf32, #tpu.memory_space<vmem>>, vector<32x32xf32>
    %55 = arith.truncf %53 : vector<8x32xf32> to vector<8x32xbf16>
    %56 = arith.truncf %54 : vector<32x32xf32> to vector<32x32xbf16>
    %cst_24 = arith.constant dense<0.000000e+00> : vector<8x32xf32>
    %57 = tpu.matmul %55, %56, %cst_24 {dimension_numbers = #tpu.dot_dimension_numbers<[1], [0], [0], [1], [0, 0, 1, 1], [], []>} : vector<8x32xbf16>, vector<32x32xbf16>, vector<8x32xf32> -> vector<8x32xf32>
    %c264 = arith.constant 264 : index
    %c0_25 = arith.constant 0 : index
    %58 = vector.load %arg3[%c264, %c0_25] : memref<648x128xf32, #tpu.memory_space<vmem>>, vector<1x32xf32>
    %59 = vector.broadcast %58 : vector<1x32xf32> to vector<8x32xf32>
    %60 = arith.addf %57, %59 : vector<8x32xf32>
    %61 = arith.addf %60, %1 : vector<8x32xf32>
    %62 = vector.broadcast %3 : vector<8x1xf32> to vector<8x32xf32>
    %63 = arith.mulf %61, %62 : vector<8x32xf32>
    %c0_26 = arith.constant 0 : index
    %c0_27 = arith.constant 0 : index
    %64 = vector.load %arg3[%c0_26, %c0_27] : memref<648x128xf32, #tpu.memory_space<vmem>>, vector<8x32xf32>
    %65 = arith.addf %63, %64 : vector<8x32xf32>
    %c272 = arith.constant 272 : index
    %c0_28 = arith.constant 0 : index
    %66 = vector.load %arg3[%c272, %c0_28] : memref<648x128xf32, #tpu.memory_space<vmem>>, vector<32x96xf32>
    %67 = arith.truncf %65 : vector<8x32xf32> to vector<8x32xbf16>
    %68 = arith.truncf %66 : vector<32x96xf32> to vector<32x96xbf16>
    %cst_29 = arith.constant dense<0.000000e+00> : vector<8x96xf32>
    %69 = tpu.matmul %67, %68, %cst_29 {dimension_numbers = #tpu.dot_dimension_numbers<[1], [0], [0], [1], [0, 0, 1, 1], [], []>} : vector<8x32xbf16>, vector<32x96xbf16>, vector<8x96xf32> -> vector<8x96xf32>
    %c304 = arith.constant 304 : index
    %c0_30 = arith.constant 0 : index
    %70 = vector.load %arg3[%c304, %c0_30] : memref<648x128xf32, #tpu.memory_space<vmem>>, vector<1x96xf32>
    %71 = vector.broadcast %70 : vector<1x96xf32> to vector<8x96xf32>
    %72 = arith.addf %69, %71 : vector<8x96xf32>
    %c312 = arith.constant 312 : index
    %c0_31 = arith.constant 0 : index
    %73 = vector.load %arg3[%c312, %c0_31] : memref<648x128xf32, #tpu.memory_space<vmem>>, vector<32x32xf32>
    %c344 = arith.constant 344 : index
    %c0_32 = arith.constant 0 : index
    %74 = vector.load %arg3[%c344, %c0_32] : memref<648x128xf32, #tpu.memory_space<vmem>>, vector<1x32xf32>
    %75 = vector.broadcast %74 : vector<1x32xf32> to vector<8x32xf32>
    %76 = arith.addf %75, %65 : vector<8x32xf32>
    %77 = vector.extract_strided_slice %72 {offsets = [0, 0], sizes = [8, 16], strides = [1, 1]} : vector<8x96xf32> to vector<8x16xf32>
    %78 = vector.extract_strided_slice %72 {offsets = [0, 32], sizes = [8, 16], strides = [1, 1]} : vector<8x96xf32> to vector<8x16xf32>
    %79 = vector.extract_strided_slice %72 {offsets = [0, 64], sizes = [8, 16], strides = [1, 1]} : vector<8x96xf32> to vector<8x16xf32>
    %80 = arith.truncf %77 : vector<8x16xf32> to vector<8x16xbf16>
    %81 = arith.truncf %78 : vector<8x16xf32> to vector<8x16xbf16>
    %cst_33 = arith.constant dense<0.000000e+00> : vector<8x8xf32>
    %82 = tpu.matmul %80, %81, %cst_33 {dimension_numbers = #tpu.dot_dimension_numbers<[1], [1], [0], [0], [0, 0, 1, 0], [], []>} : vector<8x16xbf16>, vector<8x16xbf16>, vector<8x8xf32> -> vector<8x8xf32>
    %cst_34 = arith.constant 2.500000e-01 : f32
    %83 = vector.broadcast %cst_34 : f32 to vector<8x8xf32>
    %84 = arith.mulf %82, %83 : vector<8x8xf32>
    %85 = vector.broadcast %5 : vector<1x8xf32> to vector<8x8xf32>
    %86 = arith.addf %84, %85 : vector<8x8xf32>
    %cst_35 = arith.constant dense<0xFF800000> : vector<8xf32>
    %87 = vector.multi_reduction <maximumf>, %86, %cst_35 [1] : vector<8x8xf32> to vector<8xf32>
    %88 = vector.shape_cast %87 : vector<8xf32> to vector<8x1xf32>
    %89 = vector.broadcast %88 : vector<8x1xf32> to vector<8x8xf32>
    %90 = arith.subf %86, %89 : vector<8x8xf32>
    %91 = math.exp %90 : vector<8x8xf32>
    %cst_36 = arith.constant dense<0.000000e+00> : vector<8xf32>
    %92 = vector.multi_reduction <add>, %91, %cst_36 [1] : vector<8x8xf32> to vector<8xf32>
    %93 = vector.shape_cast %92 : vector<8xf32> to vector<8x1xf32>
    %94 = tpu.reciprocal %93 {approx = true} : vector<8x1xf32> -> vector<8x1xf32>
    %95 = vector.broadcast %94 : vector<8x1xf32> to vector<8x8xf32>
    %96 = arith.mulf %91, %95 : vector<8x8xf32>
    %c0_37 = arith.constant 0 : index
    %c0_38 = arith.constant 0 : index
    %c32 = arith.constant 32 : index
    %97 = vector.load %arg4[%c0_37, %c0_38, %c32] : memref<1x8x64xf32, #tpu.memory_space<vmem>>, vector<1x8x8xf32>
    %98 = vector.shape_cast %97 : vector<1x8x8xf32> to vector<8x8xf32>
    %99 = vector.shape_cast %96 : vector<8x8xf32> to vector<1x8x8xf32>
    tpu.vector_store %arg4[%c0_37, %c0_38, %c32], %99 {strides = array<i32>} : memref<1x8x64xf32, #tpu.memory_space<vmem>>, vector<1x8x8xf32>,
    %100 = arith.truncf %96 : vector<8x8xf32> to vector<8x8xbf16>
    %101 = arith.truncf %79 : vector<8x16xf32> to vector<8x16xbf16>
    %cst_39 = arith.constant dense<0.000000e+00> : vector<8x16xf32>
    %102 = tpu.matmul %100, %101, %cst_39 {dimension_numbers = #tpu.dot_dimension_numbers<[1], [0], [0], [1], [0, 0, 1, 1], [], []>} : vector<8x8xbf16>, vector<8x16xbf16>, vector<8x16xf32> -> vector<8x16xf32>
    %103 = vector.extract_strided_slice %73 {offsets = [0, 0], sizes = [16, 32], strides = [1, 1]} : vector<32x32xf32> to vector<16x32xf32>
    %104 = arith.truncf %102 : vector<8x16xf32> to vector<8x16xbf16>
    %105 = arith.truncf %103 : vector<16x32xf32> to vector<16x32xbf16>
    %cst_40 = arith.constant dense<0.000000e+00> : vector<8x32xf32>
    %106 = tpu.matmul %104, %105, %cst_40 {dimension_numbers = #tpu.dot_dimension_numbers<[1], [0], [0], [1], [0, 0, 1, 1], [], []>} : vector<8x16xbf16>, vector<16x32xbf16>, vector<8x32xf32> -> vector<8x32xf32>
    %107 = arith.addf %76, %106 : vector<8x32xf32>
    %108 = vector.extract_strided_slice %72 {offsets = [0, 16], sizes = [8, 16], strides = [1, 1]} : vector<8x96xf32> to vector<8x16xf32>
    %109 = vector.extract_strided_slice %72 {offsets = [0, 48], sizes = [8, 16], strides = [1, 1]} : vector<8x96xf32> to vector<8x16xf32>
    %110 = vector.extract_strided_slice %72 {offsets = [0, 80], sizes = [8, 16], strides = [1, 1]} : vector<8x96xf32> to vector<8x16xf32>
    %111 = arith.truncf %108 : vector<8x16xf32> to vector<8x16xbf16>
    %112 = arith.truncf %109 : vector<8x16xf32> to vector<8x16xbf16>
    %cst_41 = arith.constant dense<0.000000e+00> : vector<8x8xf32>
    %113 = tpu.matmul %111, %112, %cst_41 {dimension_numbers = #tpu.dot_dimension_numbers<[1], [1], [0], [0], [0, 0, 1, 0], [], []>} : vector<8x16xbf16>, vector<8x16xbf16>, vector<8x8xf32> -> vector<8x8xf32>
    %cst_42 = arith.constant 2.500000e-01 : f32
    %114 = vector.broadcast %cst_42 : f32 to vector<8x8xf32>
    %115 = arith.mulf %113, %114 : vector<8x8xf32>
    %116 = vector.broadcast %5 : vector<1x8xf32> to vector<8x8xf32>
    %117 = arith.addf %115, %116 : vector<8x8xf32>
    %cst_43 = arith.constant dense<0xFF800000> : vector<8xf32>
    %118 = vector.multi_reduction <maximumf>, %117, %cst_43 [1] : vector<8x8xf32> to vector<8xf32>
    %119 = vector.shape_cast %118 : vector<8xf32> to vector<8x1xf32>
    %120 = vector.broadcast %119 : vector<8x1xf32> to vector<8x8xf32>
    %121 = arith.subf %117, %120 : vector<8x8xf32>
    %122 = math.exp %121 : vector<8x8xf32>
    %cst_44 = arith.constant dense<0.000000e+00> : vector<8xf32>
    %123 = vector.multi_reduction <add>, %122, %cst_44 [1] : vector<8x8xf32> to vector<8xf32>
    %124 = vector.shape_cast %123 : vector<8xf32> to vector<8x1xf32>
    %125 = tpu.reciprocal %124 {approx = true} : vector<8x1xf32> -> vector<8x1xf32>
    %126 = vector.broadcast %125 : vector<8x1xf32> to vector<8x8xf32>
    %127 = arith.mulf %122, %126 : vector<8x8xf32>
    %c0_45 = arith.constant 0 : index
    %c0_46 = arith.constant 0 : index
    %c40 = arith.constant 40 : index
    %128 = vector.load %arg4[%c0_45, %c0_46, %c40] : memref<1x8x64xf32, #tpu.memory_space<vmem>>, vector<1x8x8xf32>
    %129 = vector.shape_cast %128 : vector<1x8x8xf32> to vector<8x8xf32>
    %130 = vector.shape_cast %127 : vector<8x8xf32> to vector<1x8x8xf32>
    tpu.vector_store %arg4[%c0_45, %c0_46, %c40], %130 {strides = array<i32>} : memref<1x8x64xf32, #tpu.memory_space<vmem>>, vector<1x8x8xf32>,
    %131 = arith.truncf %127 : vector<8x8xf32> to vector<8x8xbf16>
    %132 = arith.truncf %110 : vector<8x16xf32> to vector<8x16xbf16>
    %cst_47 = arith.constant dense<0.000000e+00> : vector<8x16xf32>
    %133 = tpu.matmul %131, %132, %cst_47 {dimension_numbers = #tpu.dot_dimension_numbers<[1], [0], [0], [1], [0, 0, 1, 1], [], []>} : vector<8x8xbf16>, vector<8x16xbf16>, vector<8x16xf32> -> vector<8x16xf32>
    %134 = vector.extract_strided_slice %73 {offsets = [16, 0], sizes = [16, 32], strides = [1, 1]} : vector<32x32xf32> to vector<16x32xf32>
    %135 = arith.truncf %133 : vector<8x16xf32> to vector<8x16xbf16>
    %136 = arith.truncf %134 : vector<16x32xf32> to vector<16x32xbf16>
    %cst_48 = arith.constant dense<0.000000e+00> : vector<8x32xf32>
    %137 = tpu.matmul %135, %136, %cst_48 {dimension_numbers = #tpu.dot_dimension_numbers<[1], [0], [0], [1], [0, 0, 1, 1], [], []>} : vector<8x16xbf16>, vector<16x32xbf16>, vector<8x32xf32> -> vector<8x32xf32>
    %138 = arith.addf %107, %137 : vector<8x32xf32>
    %c352 = arith.constant 352 : index
    %c0_49 = arith.constant 0 : index
    %139 = vector.load %arg3[%c352, %c0_49] : memref<648x128xf32, #tpu.memory_space<vmem>>, vector<1x32xf32>
    %c360 = arith.constant 360 : index
    %c0_50 = arith.constant 0 : index
    %140 = vector.load %arg3[%c360, %c0_50] : memref<648x128xf32, #tpu.memory_space<vmem>>, vector<1x32xf32>
    %cst_51 = arith.constant dense<0.000000e+00> : vector<8xf32>
    %141 = vector.multi_reduction <add>, %138, %cst_51 [1] : vector<8x32xf32> to vector<8xf32>
    %142 = vector.shape_cast %141 : vector<8xf32> to vector<8x1xf32>
    %cst_52 = arith.constant 3.200000e+01 : f32
    %143 = vector.broadcast %cst_52 : f32 to vector<8x1xf32>
    %144 = arith.divf %142, %143 : vector<8x1xf32>
    %145 = vector.broadcast %144 : vector<8x1xf32> to vector<8x32xf32>
    %146 = arith.subf %138, %145 : vector<8x32xf32>
    %147 = arith.mulf %146, %146 : vector<8x32xf32>
    %cst_53 = arith.constant dense<0.000000e+00> : vector<8xf32>
    %148 = vector.multi_reduction <add>, %147, %cst_53 [1] : vector<8x32xf32> to vector<8xf32>
    %149 = vector.shape_cast %148 : vector<8xf32> to vector<8x1xf32>
    %cst_54 = arith.constant 3.200000e+01 : f32
    %150 = vector.broadcast %cst_54 : f32 to vector<8x1xf32>
    %151 = arith.divf %149, %150 : vector<8x1xf32>
    %152 = vector.broadcast %144 : vector<8x1xf32> to vector<8x32xf32>
    %153 = arith.subf %138, %152 : vector<8x32xf32>
    %cst_55 = arith.constant 9.99999974E-6 : f32
    %154 = vector.broadcast %cst_55 : f32 to vector<8x1xf32>
    %155 = arith.addf %151, %154 : vector<8x1xf32>
    %156 = math.rsqrt %155 : vector<8x1xf32>
    %157 = vector.broadcast %156 : vector<8x1xf32> to vector<8x32xf32>
    %158 = arith.mulf %153, %157 : vector<8x32xf32>
    %159 = vector.broadcast %139 : vector<1x32xf32> to vector<8x32xf32>
    %160 = arith.mulf %158, %159 : vector<8x32xf32>
    %161 = vector.broadcast %140 : vector<1x32xf32> to vector<8x32xf32>
    %162 = arith.addf %160, %161 : vector<8x32xf32>
    %163 = vector.broadcast %3 : vector<8x1xf32> to vector<8x32xf32>
    %164 = arith.mulf %162, %163 : vector<8x32xf32>
    %c0_56 = arith.constant 0 : index
    %c16_57 = arith.constant 16 : index
    %c0_58 = arith.constant 0 : index
    %165 = vector.load %arg2[%c0_56, %c16_57, %c0_58] : memref<1x208x8xf32, #tpu.memory_space<vmem>>, vector<1x72x8xf32>
    %166 = vector.shape_cast %165 : vector<1x72x8xf32> to vector<72x8xf32>
    %c0_59 = arith.constant 0 : index
    %c88 = arith.constant 88 : index
    %c0_60 = arith.constant 0 : index
    %167 = vector.load %arg2[%c0_59, %c88, %c0_60] : memref<1x208x8xf32, #tpu.memory_space<vmem>>, vector<1x1x8xf32>
    %168 = vector.shape_cast %167 : vector<1x1x8xf32> to vector<1x8xf32>
    %c0_61 = arith.constant 0 : index
    %c96 = arith.constant 96 : index
    %c0_62 = arith.constant 0 : index
    %169 = vector.load %arg2[%c0_61, %c96, %c0_62] : memref<1x208x8xf32, #tpu.memory_space<vmem>>, vector<1x8x8xf32>
    %170 = vector.shape_cast %169 : vector<1x8x8xf32> to vector<8x8xf32>
    %c0_63 = arith.constant 0 : index
    %c104 = arith.constant 104 : index
    %c0_64 = arith.constant 0 : index
    %171 = vector.load %arg2[%c0_63, %c104, %c0_64] : memref<1x208x8xf32, #tpu.memory_space<vmem>>, vector<1x1x8xf32>
    %172 = vector.shape_cast %171 : vector<1x1x8xf32> to vector<1x8xf32>
    %c368 = arith.constant 368 : index
    %c0_65 = arith.constant 0 : index
    %173 = vector.load %arg3[%c368, %c0_65] : memref<648x128xf32, #tpu.memory_space<vmem>>, vector<32x8xf32>
    %174 = arith.truncf %164 : vector<8x32xf32> to vector<8x32xbf16>
    %175 = arith.truncf %173 : vector<32x8xf32> to vector<32x8xbf16>
    %cst_66 = arith.constant dense<0.000000e+00> : vector<8x8xf32>
    %176 = tpu.matmul %174, %175, %cst_66 {dimension_numbers = #tpu.dot_dimension_numbers<[1], [0], [0], [1], [0, 0, 1, 1], [], []>} : vector<8x32xbf16>, vector<32x8xbf16>, vector<8x8xf32> -> vector<8x8xf32>
    %c400 = arith.constant 400 : index
    %c0_67 = arith.constant 0 : index
    %177 = vector.load %arg3[%c400, %c0_67] : memref<648x128xf32, #tpu.memory_space<vmem>>, vector<1x8xf32>
    %178 = vector.broadcast %177 : vector<1x8xf32> to vector<8x8xf32>
    %179 = arith.addf %176, %178 : vector<8x8xf32>
    %180 = math.absf %179 : vector<8x8xf32>
    %cst_68 = arith.constant 0.000000e+00 : f32
    %181 = vector.broadcast %cst_68 : f32 to vector<8x8xf32>
    %182 = arith.subf %181, %180 : vector<8x8xf32>
    %183 = math.exp %182 : vector<8x8xf32>
    %cst_69 = arith.constant 1.000000e+00 : f32
    %184 = vector.broadcast %cst_69 : f32 to vector<8x8xf32>
    %185 = arith.addf %184, %183 : vector<8x8xf32>
    %186 = math.log %185 : vector<8x8xf32>
    %cst_70 = arith.constant 0.000000e+00 : f32
    %187 = vector.broadcast %cst_70 : f32 to vector<8x8xf32>
    %188 = arith.maximumf %179, %187 : vector<8x8xf32>
    %189 = arith.addf %186, %188 : vector<8x8xf32>
    %190 = math.tanh %189 : vector<8x8xf32>
    %191 = arith.mulf %179, %190 : vector<8x8xf32>
    %c4_i32 = arith.constant 4 : i32
    %192 = tpu.dynamic_rotate %191 by %c4_i32 dim 0 : vector<8x8xf32>, i32 -> vector<8x8xf32>
    %c3_i32 = arith.constant 3 : i32
    %193 = tpu.dynamic_rotate %191 by %c3_i32 dim 0 : vector<8x8xf32>, i32 -> vector<8x8xf32>
    %c2_i32 = arith.constant 2 : i32
    %194 = tpu.dynamic_rotate %191 by %c2_i32 dim 0 : vector<8x8xf32>, i32 -> vector<8x8xf32>
    %c1_i32_71 = arith.constant 1 : i32
    %195 = tpu.dynamic_rotate %191 by %c1_i32_71 dim 0 : vector<8x8xf32>, i32 -> vector<8x8xf32>
    %c7_i32_72 = arith.constant 7 : i32
    %196 = tpu.dynamic_rotate %191 by %c7_i32_72 dim 0 : vector<8x8xf32>, i32 -> vector<8x8xf32>
    %c6_i32 = arith.constant 6 : i32
    %197 = tpu.dynamic_rotate %191 by %c6_i32 dim 0 : vector<8x8xf32>, i32 -> vector<8x8xf32>
    %c5_i32 = arith.constant 5 : i32
    %198 = tpu.dynamic_rotate %191 by %c5_i32 dim 0 : vector<8x8xf32>, i32 -> vector<8x8xf32>
    %199 = tpu.concatenate %192, %193, %194, %195, %191, %196, %197, %198, %192 in 1 : vector<8x8xf32>, vector<8x8xf32>, vector<8x8xf32>, vector<8x8xf32>, vector<8x8xf32>, vector<8x8xf32>, vector<8x8xf32>, vector<8x8xf32>, vector<8x8xf32> -> vector<8x72xf32>
    %200 = arith.mulf %199, %7 : vector<8x72xf32>
    %201 = arith.truncf %200 : vector<8x72xf32> to vector<8x72xbf16>
    %202 = arith.truncf %166 : vector<72x8xf32> to vector<72x8xbf16>
    %cst_73 = arith.constant dense<0.000000e+00> : vector<8x8xf32>
    %203 = tpu.matmul %201, %202, %cst_73 {dimension_numbers = #tpu.dot_dimension_numbers<[1], [0], [0], [1], [0, 0, 1, 1], [], []>} : vector<8x72xbf16>, vector<72x8xbf16>, vector<8x8xf32> -> vector<8x8xf32>
    %204 = vector.broadcast %168 : vector<1x8xf32> to vector<8x8xf32>
    %205 = arith.addf %203, %204 : vector<8x8xf32>
    %206 = arith.truncf %205 : vector<8x8xf32> to vector<8x8xbf16>
    %207 = arith.truncf %170 : vector<8x8xf32> to vector<8x8xbf16>
    %cst_74 = arith.constant dense<0.000000e+00> : vector<8x8xf32>
    %208 = tpu.matmul %206, %207, %cst_74 {dimension_numbers = #tpu.dot_dimension_numbers<[1], [0], [0], [1], [0, 0, 1, 1], [], []>} : vector<8x8xbf16>, vector<8x8xbf16>, vector<8x8xf32> -> vector<8x8xf32>
    %209 = vector.broadcast %172 : vector<1x8xf32> to vector<8x8xf32>
    %210 = arith.addf %208, %209 : vector<8x8xf32>
    %c408 = arith.constant 408 : index
    %c0_75 = arith.constant 0 : index
    %211 = vector.load %arg3[%c408, %c0_75] : memref<648x128xf32, #tpu.memory_space<vmem>>, vector<8x32xf32>
    %212 = arith.truncf %210 : vector<8x8xf32> to vector<8x8xbf16>
    %213 = arith.truncf %211 : vector<8x32xf32> to vector<8x32xbf16>
    %cst_76 = arith.constant dense<0.000000e+00> : vector<8x32xf32>
    %214 = tpu.matmul %212, %213, %cst_76 {dimension_numbers = #tpu.dot_dimension_numbers<[1], [0], [0], [1], [0, 0, 1, 1], [], []>} : vector<8x8xbf16>, vector<8x32xbf16>, vector<8x32xf32> -> vector<8x32xf32>
    %c416 = arith.constant 416 : index
    %c0_77 = arith.constant 0 : index
    %215 = vector.load %arg3[%c416, %c0_77] : memref<648x128xf32, #tpu.memory_space<vmem>>, vector<1x32xf32>
    %216 = vector.broadcast %215 : vector<1x32xf32> to vector<8x32xf32>
    %217 = arith.addf %214, %216 : vector<8x32xf32>
    %218 = arith.addf %217, %164 : vector<8x32xf32>
    %c424 = arith.constant 424 : index
    %c0_78 = arith.constant 0 : index
    %219 = vector.load %arg3[%c424, %c0_78] : memref<648x128xf32, #tpu.memory_space<vmem>>, vector<1x32xf32>
    %c432 = arith.constant 432 : index
    %c0_79 = arith.constant 0 : index
    %220 = vector.load %arg3[%c432, %c0_79] : memref<648x128xf32, #tpu.memory_space<vmem>>, vector<1x32xf32>
    %cst_80 = arith.constant dense<0.000000e+00> : vector<8xf32>
    %221 = vector.multi_reduction <add>, %218, %cst_80 [1] : vector<8x32xf32> to vector<8xf32>
    %222 = vector.shape_cast %221 : vector<8xf32> to vector<8x1xf32>
    %cst_81 = arith.constant 3.200000e+01 : f32
    %223 = vector.broadcast %cst_81 : f32 to vector<8x1xf32>
    %224 = arith.divf %222, %223 : vector<8x1xf32>
    %225 = vector.broadcast %224 : vector<8x1xf32> to vector<8x32xf32>
    %226 = arith.subf %218, %225 : vector<8x32xf32>
    %227 = arith.mulf %226, %226 : vector<8x32xf32>
    %cst_82 = arith.constant dense<0.000000e+00> : vector<8xf32>
    %228 = vector.multi_reduction <add>, %227, %cst_82 [1] : vector<8x32xf32> to vector<8xf32>
    %229 = vector.shape_cast %228 : vector<8xf32> to vector<8x1xf32>
    %cst_83 = arith.constant 3.200000e+01 : f32
    %230 = vector.broadcast %cst_83 : f32 to vector<8x1xf32>
    %231 = arith.divf %229, %230 : vector<8x1xf32>
    %232 = vector.broadcast %224 : vector<8x1xf32> to vector<8x32xf32>
    %233 = arith.subf %218, %232 : vector<8x32xf32>
    %cst_84 = arith.constant 9.99999974E-6 : f32
    %234 = vector.broadcast %cst_84 : f32 to vector<8x1xf32>
    %235 = arith.addf %231, %234 : vector<8x1xf32>
    %236 = math.rsqrt %235 : vector<8x1xf32>
    %237 = vector.broadcast %236 : vector<8x1xf32> to vector<8x32xf32>
    %238 = arith.mulf %233, %237 : vector<8x32xf32>
    %239 = vector.broadcast %219 : vector<1x32xf32> to vector<8x32xf32>
    %240 = arith.mulf %238, %239 : vector<8x32xf32>
    %241 = vector.broadcast %220 : vector<1x32xf32> to vector<8x32xf32>
    %242 = arith.addf %240, %241 : vector<8x32xf32>
    %243 = vector.broadcast %3 : vector<8x1xf32> to vector<8x32xf32>
    %244 = arith.mulf %242, %243 : vector<8x32xf32>
    %c440 = arith.constant 440 : index
    %c0_85 = arith.constant 0 : index
    %245 = vector.load %arg3[%c440, %c0_85] : memref<648x128xf32, #tpu.memory_space<vmem>>, vector<32x96xf32>
    %246 = arith.truncf %244 : vector<8x32xf32> to vector<8x32xbf16>
    %247 = arith.truncf %245 : vector<32x96xf32> to vector<32x96xbf16>
    %cst_86 = arith.constant dense<0.000000e+00> : vector<8x96xf32>
    %248 = tpu.matmul %246, %247, %cst_86 {dimension_numbers = #tpu.dot_dimension_numbers<[1], [0], [0], [1], [0, 0, 1, 1], [], []>} : vector<8x32xbf16>, vector<32x96xbf16>, vector<8x96xf32> -> vector<8x96xf32>
    %c472 = arith.constant 472 : index
    %c0_87 = arith.constant 0 : index
    %249 = vector.load %arg3[%c472, %c0_87] : memref<648x128xf32, #tpu.memory_space<vmem>>, vector<1x96xf32>
    %250 = vector.broadcast %249 : vector<1x96xf32> to vector<8x96xf32>
    %251 = arith.addf %248, %250 : vector<8x96xf32>
    %c480 = arith.constant 480 : index
    %c0_88 = arith.constant 0 : index
    %252 = vector.load %arg3[%c480, %c0_88] : memref<648x128xf32, #tpu.memory_space<vmem>>, vector<32x32xf32>
    %c512 = arith.constant 512 : index
    %c0_89 = arith.constant 0 : index
    %253 = vector.load %arg3[%c512, %c0_89] : memref<648x128xf32, #tpu.memory_space<vmem>>, vector<1x32xf32>
    %254 = vector.broadcast %253 : vector<1x32xf32> to vector<8x32xf32>
    %255 = arith.addf %254, %244 : vector<8x32xf32>
    %256 = vector.extract_strided_slice %251 {offsets = [0, 0], sizes = [8, 16], strides = [1, 1]} : vector<8x96xf32> to vector<8x16xf32>
    %257 = vector.extract_strided_slice %251 {offsets = [0, 32], sizes = [8, 16], strides = [1, 1]} : vector<8x96xf32> to vector<8x16xf32>
    %258 = vector.extract_strided_slice %251 {offsets = [0, 64], sizes = [8, 16], strides = [1, 1]} : vector<8x96xf32> to vector<8x16xf32>
    %259 = arith.truncf %256 : vector<8x16xf32> to vector<8x16xbf16>
    %260 = arith.truncf %257 : vector<8x16xf32> to vector<8x16xbf16>
    %cst_90 = arith.constant dense<0.000000e+00> : vector<8x8xf32>
    %261 = tpu.matmul %259, %260, %cst_90 {dimension_numbers = #tpu.dot_dimension_numbers<[1], [1], [0], [0], [0, 0, 1, 0], [], []>} : vector<8x16xbf16>, vector<8x16xbf16>, vector<8x8xf32> -> vector<8x8xf32>
    %cst_91 = arith.constant 2.500000e-01 : f32
    %262 = vector.broadcast %cst_91 : f32 to vector<8x8xf32>
    %263 = arith.mulf %261, %262 : vector<8x8xf32>
    %264 = vector.broadcast %5 : vector<1x8xf32> to vector<8x8xf32>
    %265 = arith.addf %263, %264 : vector<8x8xf32>
    %cst_92 = arith.constant dense<0xFF800000> : vector<8xf32>
    %266 = vector.multi_reduction <maximumf>, %265, %cst_92 [1] : vector<8x8xf32> to vector<8xf32>
    %267 = vector.shape_cast %266 : vector<8xf32> to vector<8x1xf32>
    %268 = vector.broadcast %267 : vector<8x1xf32> to vector<8x8xf32>
    %269 = arith.subf %265, %268 : vector<8x8xf32>
    %270 = math.exp %269 : vector<8x8xf32>
    %cst_93 = arith.constant dense<0.000000e+00> : vector<8xf32>
    %271 = vector.multi_reduction <add>, %270, %cst_93 [1] : vector<8x8xf32> to vector<8xf32>
    %272 = vector.shape_cast %271 : vector<8xf32> to vector<8x1xf32>
    %273 = tpu.reciprocal %272 {approx = true} : vector<8x1xf32> -> vector<8x1xf32>
    %274 = vector.broadcast %273 : vector<8x1xf32> to vector<8x8xf32>
    %275 = arith.mulf %270, %274 : vector<8x8xf32>
    %c0_94 = arith.constant 0 : index
    %c0_95 = arith.constant 0 : index
    %c48 = arith.constant 48 : index
    %276 = vector.load %arg4[%c0_94, %c0_95, %c48] : memref<1x8x64xf32, #tpu.memory_space<vmem>>, vector<1x8x8xf32>
    %277 = vector.shape_cast %276 : vector<1x8x8xf32> to vector<8x8xf32>
    %278 = vector.shape_cast %275 : vector<8x8xf32> to vector<1x8x8xf32>
    tpu.vector_store %arg4[%c0_94, %c0_95, %c48], %278 {strides = array<i32>} : memref<1x8x64xf32, #tpu.memory_space<vmem>>, vector<1x8x8xf32>,
    %279 = arith.truncf %275 : vector<8x8xf32> to vector<8x8xbf16>
    %280 = arith.truncf %258 : vector<8x16xf32> to vector<8x16xbf16>
    %cst_96 = arith.constant dense<0.000000e+00> : vector<8x16xf32>
    %281 = tpu.matmul %279, %280, %cst_96 {dimension_numbers = #tpu.dot_dimension_numbers<[1], [0], [0], [1], [0, 0, 1, 1], [], []>} : vector<8x8xbf16>, vector<8x16xbf16>, vector<8x16xf32> -> vector<8x16xf32>
    %282 = vector.extract_strided_slice %252 {offsets = [0, 0], sizes = [16, 32], strides = [1, 1]} : vector<32x32xf32> to vector<16x32xf32>
    %283 = arith.truncf %281 : vector<8x16xf32> to vector<8x16xbf16>
    %284 = arith.truncf %282 : vector<16x32xf32> to vector<16x32xbf16>
    %cst_97 = arith.constant dense<0.000000e+00> : vector<8x32xf32>
    %285 = tpu.matmul %283, %284, %cst_97 {dimension_numbers = #tpu.dot_dimension_numbers<[1], [0], [0], [1], [0, 0, 1, 1], [], []>} : vector<8x16xbf16>, vector<16x32xbf16>, vector<8x32xf32> -> vector<8x32xf32>
    %286 = arith.addf %255, %285 : vector<8x32xf32>
    %287 = vector.extract_strided_slice %251 {offsets = [0, 16], sizes = [8, 16], strides = [1, 1]} : vector<8x96xf32> to vector<8x16xf32>
    %288 = vector.extract_strided_slice %251 {offsets = [0, 48], sizes = [8, 16], strides = [1, 1]} : vector<8x96xf32> to vector<8x16xf32>
    %289 = vector.extract_strided_slice %251 {offsets = [0, 80], sizes = [8, 16], strides = [1, 1]} : vector<8x96xf32> to vector<8x16xf32>
    %290 = arith.truncf %287 : vector<8x16xf32> to vector<8x16xbf16>
    %291 = arith.truncf %288 : vector<8x16xf32> to vector<8x16xbf16>
    %cst_98 = arith.constant dense<0.000000e+00> : vector<8x8xf32>
    %292 = tpu.matmul %290, %291, %cst_98 {dimension_numbers = #tpu.dot_dimension_numbers<[1], [1], [0], [0], [0, 0, 1, 0], [], []>} : vector<8x16xbf16>, vector<8x16xbf16>, vector<8x8xf32> -> vector<8x8xf32>
    %cst_99 = arith.constant 2.500000e-01 : f32
    %293 = vector.broadcast %cst_99 : f32 to vector<8x8xf32>
    %294 = arith.mulf %292, %293 : vector<8x8xf32>
    %295 = vector.broadcast %5 : vector<1x8xf32> to vector<8x8xf32>
    %296 = arith.addf %294, %295 : vector<8x8xf32>
    %cst_100 = arith.constant dense<0xFF800000> : vector<8xf32>
    %297 = vector.multi_reduction <maximumf>, %296, %cst_100 [1] : vector<8x8xf32> to vector<8xf32>
    %298 = vector.shape_cast %297 : vector<8xf32> to vector<8x1xf32>
    %299 = vector.broadcast %298 : vector<8x1xf32> to vector<8x8xf32>
    %300 = arith.subf %296, %299 : vector<8x8xf32>
    %301 = math.exp %300 : vector<8x8xf32>
    %cst_101 = arith.constant dense<0.000000e+00> : vector<8xf32>
    %302 = vector.multi_reduction <add>, %301, %cst_101 [1] : vector<8x8xf32> to vector<8xf32>
    %303 = vector.shape_cast %302 : vector<8xf32> to vector<8x1xf32>
    %304 = tpu.reciprocal %303 {approx = true} : vector<8x1xf32> -> vector<8x1xf32>
    %305 = vector.broadcast %304 : vector<8x1xf32> to vector<8x8xf32>
    %306 = arith.mulf %301, %305 : vector<8x8xf32>
    %c0_102 = arith.constant 0 : index
    %c0_103 = arith.constant 0 : index
    %c56 = arith.constant 56 : index
    %307 = vector.load %arg4[%c0_102, %c0_103, %c56] : memref<1x8x64xf32, #tpu.memory_space<vmem>>, vector<1x8x8xf32>
    %308 = vector.shape_cast %307 : vector<1x8x8xf32> to vector<8x8xf32>
    %309 = vector.shape_cast %306 : vector<8x8xf32> to vector<1x8x8xf32>
    tpu.vector_store %arg4[%c0_102, %c0_103, %c56], %309 {strides = array<i32>} : memref<1x8x64xf32, #tpu.memory_space<vmem>>, vector<1x8x8xf32>,
    %310 = arith.truncf %306 : vector<8x8xf32> to vector<8x8xbf16>
    %311 = arith.truncf %289 : vector<8x16xf32> to vector<8x16xbf16>
    %cst_104 = arith.constant dense<0.000000e+00> : vector<8x16xf32>
    %312 = tpu.matmul %310, %311, %cst_104 {dimension_numbers = #tpu.dot_dimension_numbers<[1], [0], [0], [1], [0, 0, 1, 1], [], []>} : vector<8x8xbf16>, vector<8x16xbf16>, vector<8x16xf32> -> vector<8x16xf32>
    %313 = vector.extract_strided_slice %252 {offsets = [16, 0], sizes = [16, 32], strides = [1, 1]} : vector<32x32xf32> to vector<16x32xf32>
    %314 = arith.truncf %312 : vector<8x16xf32> to vector<8x16xbf16>
    %315 = arith.truncf %313 : vector<16x32xf32> to vector<16x32xbf16>
    %cst_105 = arith.constant dense<0.000000e+00> : vector<8x32xf32>
    %316 = tpu.matmul %314, %315, %cst_105 {dimension_numbers = #tpu.dot_dimension_numbers<[1], [0], [0], [1], [0, 0, 1, 1], [], []>} : vector<8x16xbf16>, vector<16x32xbf16>, vector<8x32xf32> -> vector<8x32xf32>
    %317 = arith.addf %286, %316 : vector<8x32xf32>
    %c520 = arith.constant 520 : index
    %c0_106 = arith.constant 0 : index
    %318 = vector.load %arg3[%c520, %c0_106] : memref<648x128xf32, #tpu.memory_space<vmem>>, vector<1x32xf32>
    %c528 = arith.constant 528 : index
    %c0_107 = arith.constant 0 : index
    %319 = vector.load %arg3[%c528, %c0_107] : memref<648x128xf32, #tpu.memory_space<vmem>>, vector<1x32xf32>
    %cst_108 = arith.constant dense<0.000000e+00> : vector<8xf32>
    %320 = vector.multi_reduction <add>, %317, %cst_108 [1] : vector<8x32xf32> to vector<8xf32>
    %321 = vector.shape_cast %320 : vector<8xf32> to vector<8x1xf32>
    %cst_109 = arith.constant 3.200000e+01 : f32
    %322 = vector.broadcast %cst_109 : f32 to vector<8x1xf32>
    %323 = arith.divf %321, %322 : vector<8x1xf32>
    %324 = vector.broadcast %323 : vector<8x1xf32> to vector<8x32xf32>
    %325 = arith.subf %317, %324 : vector<8x32xf32>
    %326 = arith.mulf %325, %325 : vector<8x32xf32>
    %cst_110 = arith.constant dense<0.000000e+00> : vector<8xf32>
    %327 = vector.multi_reduction <add>, %326, %cst_110 [1] : vector<8x32xf32> to vector<8xf32>
    %328 = vector.shape_cast %327 : vector<8xf32> to vector<8x1xf32>
    %cst_111 = arith.constant 3.200000e+01 : f32
    %329 = vector.broadcast %cst_111 : f32 to vector<8x1xf32>
    %330 = arith.divf %328, %329 : vector<8x1xf32>
    %331 = vector.broadcast %323 : vector<8x1xf32> to vector<8x32xf32>
    %332 = arith.subf %317, %331 : vector<8x32xf32>
    %cst_112 = arith.constant 9.99999974E-6 : f32
    %333 = vector.broadcast %cst_112 : f32 to vector<8x1xf32>
    %334 = arith.addf %330, %333 : vector<8x1xf32>
    %335 = math.rsqrt %334 : vector<8x1xf32>
    %336 = vector.broadcast %335 : vector<8x1xf32> to vector<8x32xf32>
    %337 = arith.mulf %332, %336 : vector<8x32xf32>
    %338 = vector.broadcast %318 : vector<1x32xf32> to vector<8x32xf32>
    %339 = arith.mulf %337, %338 : vector<8x32xf32>
    %340 = vector.broadcast %319 : vector<1x32xf32> to vector<8x32xf32>
    %341 = arith.addf %339, %340 : vector<8x32xf32>
    %342 = vector.broadcast %3 : vector<8x1xf32> to vector<8x32xf32>
    %343 = arith.mulf %341, %342 : vector<8x32xf32>
    %c0_113 = arith.constant 0 : index
    %c112 = arith.constant 112 : index
    %c0_114 = arith.constant 0 : index
    %344 = vector.load %arg2[%c0_113, %c112, %c0_114] : memref<1x208x8xf32, #tpu.memory_space<vmem>>, vector<1x72x8xf32>
    %345 = vector.shape_cast %344 : vector<1x72x8xf32> to vector<72x8xf32>
    %c0_115 = arith.constant 0 : index
    %c184 = arith.constant 184 : index
    %c0_116 = arith.constant 0 : index
    %346 = vector.load %arg2[%c0_115, %c184, %c0_116] : memref<1x208x8xf32, #tpu.memory_space<vmem>>, vector<1x1x8xf32>
    %347 = vector.shape_cast %346 : vector<1x1x8xf32> to vector<1x8xf32>
    %c0_117 = arith.constant 0 : index
    %c192 = arith.constant 192 : index
    %c0_118 = arith.constant 0 : index
    %348 = vector.load %arg2[%c0_117, %c192, %c0_118] : memref<1x208x8xf32, #tpu.memory_space<vmem>>, vector<1x8x8xf32>
    %349 = vector.shape_cast %348 : vector<1x8x8xf32> to vector<8x8xf32>
    %c0_119 = arith.constant 0 : index
    %c200 = arith.constant 200 : index
    %c0_120 = arith.constant 0 : index
    %350 = vector.load %arg2[%c0_119, %c200, %c0_120] : memref<1x208x8xf32, #tpu.memory_space<vmem>>, vector<1x1x8xf32>
    %351 = vector.shape_cast %350 : vector<1x1x8xf32> to vector<1x8xf32>
    %c536 = arith.constant 536 : index
    %c0_121 = arith.constant 0 : index
    %352 = vector.load %arg3[%c536, %c0_121] : memref<648x128xf32, #tpu.memory_space<vmem>>, vector<32x8xf32>
    %353 = arith.truncf %343 : vector<8x32xf32> to vector<8x32xbf16>
    %354 = arith.truncf %352 : vector<32x8xf32> to vector<32x8xbf16>
    %cst_122 = arith.constant dense<0.000000e+00> : vector<8x8xf32>
    %355 = tpu.matmul %353, %354, %cst_122 {dimension_numbers = #tpu.dot_dimension_numbers<[1], [0], [0], [1], [0, 0, 1, 1], [], []>} : vector<8x32xbf16>, vector<32x8xbf16>, vector<8x8xf32> -> vector<8x8xf32>
    %c568 = arith.constant 568 : index
    %c0_123 = arith.constant 0 : index
    %356 = vector.load %arg3[%c568, %c0_123] : memref<648x128xf32, #tpu.memory_space<vmem>>, vector<1x8xf32>
    %357 = vector.broadcast %356 : vector<1x8xf32> to vector<8x8xf32>
    %358 = arith.addf %355, %357 : vector<8x8xf32>
    %359 = math.absf %358 : vector<8x8xf32>
    %cst_124 = arith.constant 0.000000e+00 : f32
    %360 = vector.broadcast %cst_124 : f32 to vector<8x8xf32>
    %361 = arith.subf %360, %359 : vector<8x8xf32>
    %362 = math.exp %361 : vector<8x8xf32>
    %cst_125 = arith.constant 1.000000e+00 : f32
    %363 = vector.broadcast %cst_125 : f32 to vector<8x8xf32>
    %364 = arith.addf %363, %362 : vector<8x8xf32>
    %365 = math.log %364 : vector<8x8xf32>
    %cst_126 = arith.constant 0.000000e+00 : f32
    %366 = vector.broadcast %cst_126 : f32 to vector<8x8xf32>
    %367 = arith.maximumf %358, %366 : vector<8x8xf32>
    %368 = arith.addf %365, %367 : vector<8x8xf32>
    %369 = math.tanh %368 : vector<8x8xf32>
    %370 = arith.mulf %358, %369 : vector<8x8xf32>
    %c4_i32_127 = arith.constant 4 : i32
    %371 = tpu.dynamic_rotate %370 by %c4_i32_127 dim 0 : vector<8x8xf32>, i32 -> vector<8x8xf32>
    %c3_i32_128 = arith.constant 3 : i32
    %372 = tpu.dynamic_rotate %370 by %c3_i32_128 dim 0 : vector<8x8xf32>, i32 -> vector<8x8xf32>
    %c2_i32_129 = arith.constant 2 : i32
    %373 = tpu.dynamic_rotate %370 by %c2_i32_129 dim 0 : vector<8x8xf32>, i32 -> vector<8x8xf32>
    %c1_i32_130 = arith.constant 1 : i32
    %374 = tpu.dynamic_rotate %370 by %c1_i32_130 dim 0 : vector<8x8xf32>, i32 -> vector<8x8xf32>
    %c7_i32_131 = arith.constant 7 : i32
    %375 = tpu.dynamic_rotate %370 by %c7_i32_131 dim 0 : vector<8x8xf32>, i32 -> vector<8x8xf32>
    %c6_i32_132 = arith.constant 6 : i32
    %376 = tpu.dynamic_rotate %370 by %c6_i32_132 dim 0 : vector<8x8xf32>, i32 -> vector<8x8xf32>
    %c5_i32_133 = arith.constant 5 : i32
    %377 = tpu.dynamic_rotate %370 by %c5_i32_133 dim 0 : vector<8x8xf32>, i32 -> vector<8x8xf32>
    %378 = tpu.concatenate %371, %372, %373, %374, %370, %375, %376, %377, %371 in 1 : vector<8x8xf32>, vector<8x8xf32>, vector<8x8xf32>, vector<8x8xf32>, vector<8x8xf32>, vector<8x8xf32>, vector<8x8xf32>, vector<8x8xf32>, vector<8x8xf32> -> vector<8x72xf32>
    %379 = arith.mulf %378, %7 : vector<8x72xf32>
    %380 = arith.truncf %379 : vector<8x72xf32> to vector<8x72xbf16>
    %381 = arith.truncf %345 : vector<72x8xf32> to vector<72x8xbf16>
    %cst_134 = arith.constant dense<0.000000e+00> : vector<8x8xf32>
    %382 = tpu.matmul %380, %381, %cst_134 {dimension_numbers = #tpu.dot_dimension_numbers<[1], [0], [0], [1], [0, 0, 1, 1], [], []>} : vector<8x72xbf16>, vector<72x8xbf16>, vector<8x8xf32> -> vector<8x8xf32>
    %383 = vector.broadcast %347 : vector<1x8xf32> to vector<8x8xf32>
    %384 = arith.addf %382, %383 : vector<8x8xf32>
    %385 = arith.truncf %384 : vector<8x8xf32> to vector<8x8xbf16>
    %386 = arith.truncf %349 : vector<8x8xf32> to vector<8x8xbf16>
    %cst_135 = arith.constant dense<0.000000e+00> : vector<8x8xf32>
    %387 = tpu.matmul %385, %386, %cst_135 {dimension_numbers = #tpu.dot_dimension_numbers<[1], [0], [0], [1], [0, 0, 1, 1], [], []>} : vector<8x8xbf16>, vector<8x8xbf16>, vector<8x8xf32> -> vector<8x8xf32>
    %388 = vector.broadcast %351 : vector<1x8xf32> to vector<8x8xf32>
    %389 = arith.addf %387, %388 : vector<8x8xf32>
    %c576 = arith.constant 576 : index
    %c0_136 = arith.constant 0 : index
    %390 = vector.load %arg3[%c576, %c0_136] : memref<648x128xf32, #tpu.memory_space<vmem>>, vector<8x32xf32>
    %391 = arith.truncf %389 : vector<8x8xf32> to vector<8x8xbf16>
    %392 = arith.truncf %390 : vector<8x32xf32> to vector<8x32xbf16>
    %cst_137 = arith.constant dense<0.000000e+00> : vector<8x32xf32>
    %393 = tpu.matmul %391, %392, %cst_137 {dimension_numbers = #tpu.dot_dimension_numbers<[1], [0], [0], [1], [0, 0, 1, 1], [], []>} : vector<8x8xbf16>, vector<8x32xbf16>, vector<8x32xf32> -> vector<8x32xf32>
    %c584 = arith.constant 584 : index
    %c0_138 = arith.constant 0 : index
    %394 = vector.load %arg3[%c584, %c0_138] : memref<648x128xf32, #tpu.memory_space<vmem>>, vector<1x32xf32>
    %395 = vector.broadcast %394 : vector<1x32xf32> to vector<8x32xf32>
    %396 = arith.addf %393, %395 : vector<8x32xf32>
    %397 = arith.addf %396, %343 : vector<8x32xf32>
    %c592 = arith.constant 592 : index
    %c0_139 = arith.constant 0 : index
    %398 = vector.load %arg3[%c592, %c0_139] : memref<648x128xf32, #tpu.memory_space<vmem>>, vector<1x32xf32>
    %c600 = arith.constant 600 : index
    %c0_140 = arith.constant 0 : index
    %399 = vector.load %arg3[%c600, %c0_140] : memref<648x128xf32, #tpu.memory_space<vmem>>, vector<1x32xf32>
    %cst_141 = arith.constant dense<0.000000e+00> : vector<8xf32>
    %400 = vector.multi_reduction <add>, %397, %cst_141 [1] : vector<8x32xf32> to vector<8xf32>
    %401 = vector.shape_cast %400 : vector<8xf32> to vector<8x1xf32>
    %cst_142 = arith.constant 3.200000e+01 : f32
    %402 = vector.broadcast %cst_142 : f32 to vector<8x1xf32>
    %403 = arith.divf %401, %402 : vector<8x1xf32>
    %404 = vector.broadcast %403 : vector<8x1xf32> to vector<8x32xf32>
    %405 = arith.subf %397, %404 : vector<8x32xf32>
    %406 = arith.mulf %405, %405 : vector<8x32xf32>
    %cst_143 = arith.constant dense<0.000000e+00> : vector<8xf32>
    %407 = vector.multi_reduction <add>, %406, %cst_143 [1] : vector<8x32xf32> to vector<8xf32>
    %408 = vector.shape_cast %407 : vector<8xf32> to vector<8x1xf32>
    %cst_144 = arith.constant 3.200000e+01 : f32
    %409 = vector.broadcast %cst_144 : f32 to vector<8x1xf32>
    %410 = arith.divf %408, %409 : vector<8x1xf32>
    %411 = vector.broadcast %403 : vector<8x1xf32> to vector<8x32xf32>
    %412 = arith.subf %397, %411 : vector<8x32xf32>
    %cst_145 = arith.constant 9.99999974E-6 : f32
    %413 = vector.broadcast %cst_145 : f32 to vector<8x1xf32>
    %414 = arith.addf %410, %413 : vector<8x1xf32>
    %415 = math.rsqrt %414 : vector<8x1xf32>
    %416 = vector.broadcast %415 : vector<8x1xf32> to vector<8x32xf32>
    %417 = arith.mulf %412, %416 : vector<8x32xf32>
    %418 = vector.broadcast %398 : vector<1x32xf32> to vector<8x32xf32>
    %419 = arith.mulf %417, %418 : vector<8x32xf32>
    %420 = vector.broadcast %399 : vector<1x32xf32> to vector<8x32xf32>
    %421 = arith.addf %419, %420 : vector<8x32xf32>
    %422 = vector.broadcast %3 : vector<8x1xf32> to vector<8x32xf32>
    %423 = arith.mulf %421, %422 : vector<8x32xf32>
    %c608 = arith.constant 608 : index
    %c0_146 = arith.constant 0 : index
    %424 = vector.load %arg3[%c608, %c0_146] : memref<648x128xf32, #tpu.memory_space<vmem>>, vector<32x32xf32>
    %425 = arith.truncf %423 : vector<8x32xf32> to vector<8x32xbf16>
    %426 = arith.truncf %424 : vector<32x32xf32> to vector<32x32xbf16>
    %cst_147 = arith.constant dense<0.000000e+00> : vector<8x32xf32>
    %427 = tpu.matmul %425, %426, %cst_147 {dimension_numbers = #tpu.dot_dimension_numbers<[1], [0], [0], [1], [0, 0, 1, 1], [], []>} : vector<8x32xbf16>, vector<32x32xbf16>, vector<8x32xf32> -> vector<8x32xf32>
    %c640 = arith.constant 640 : index
    %c0_148 = arith.constant 0 : index
    %428 = vector.load %arg3[%c640, %c0_148] : memref<648x128xf32, #tpu.memory_space<vmem>>, vector<1x32xf32>
    %429 = vector.broadcast %428 : vector<1x32xf32> to vector<8x32xf32>
    %430 = arith.addf %427, %429 : vector<8x32xf32>
    %c0_149 = arith.constant 0 : index
    %c0_150 = arith.constant 0 : index
    %c0_151 = arith.constant 0 : index
    %431 = vector.load %arg4[%c0_149, %c0_150, %c0_151] : memref<1x8x64xf32, #tpu.memory_space<vmem>>, vector<1x8x32xf32>
    %432 = vector.shape_cast %431 : vector<1x8x32xf32> to vector<8x32xf32>
    %433 = vector.shape_cast %430 : vector<8x32xf32> to vector<1x8x32xf32>
    tpu.vector_store %arg4[%c0_149, %c0_150, %c0_151], %433 {strides = array<i32>} : memref<1x8x64xf32, #tpu.memory_space<vmem>>, vector<1x8x32xf32>,
    return
  }
  func.func @transform_0(%arg0: i32) -> (i32, i32, i32) {
    %c0_i32 = arith.constant 0 : i32
    %c0_i32_0 = arith.constant 0 : i32
    %c0_i32_1 = arith.constant 0 : i32
    return %arg0, %c0_i32, %c0_i32_0 : i32, i32, i32
  }
  func.func @transform_1(%arg0: i32) -> (i32, i32, i32) {
    %c0_i32 = arith.constant 0 : i32
    %c0_i32_0 = arith.constant 0 : i32
    %c0_i32_1 = arith.constant 0 : i32
    return %arg0, %c0_i32, %c0_i32_0 : i32, i32, i32
  }
  func.func @transform_2(%arg0: i32) -> (i32, i32) {
    %c0_i32 = arith.constant 0 : i32
    %c0_i32_0 = arith.constant 0 : i32
    %c0_i32_1 = arith.constant 0 : i32
    return %c0_i32, %c0_i32_0 : i32, i32
  }
  func.func @transform_3(%arg0: i32) -> (i32, i32, i32) {
    %c0_i32 = arith.constant 0 : i32
    %c0_i32_0 = arith.constant 0 : i32
    %c0_i32_1 = arith.constant 0 : i32
    return %arg0, %c0_i32, %c0_i32_0 : i32, i32, i32
  }
}

</mosaic_0001>

<bundles_post_ra>
// kernel: mul.24
= control target key start
LH: loop header
LB: loop body
LE: loop exit
PB: predicated region body
PF: predicated region fallthrough
CT: control target
= control target key end

     0   :  { %vm7_vm0 = vcmask 64512   ;;  %s48_s0 = inlined_call_operand.vmem [shape: f32[2,16], index: 0, kind: input, shape index: {}]   ;;  %s49_s1 = inlined_call_operand.vmem [shape: f32[2,2,8], index: 1, kind: output, shape index: {}]  }
   0x1   :  { %v4_v0 = vld [vmem:[%s48_s0] sm:$0x3]  ;;  %s28_s0 = smov 120  }
   0x2   :  { %5 = vst [vmem:[#allocation1] sm:$0x3] %v4_v0 }
   0x9   :  { %v9_v1 = vld [vmem:[#allocation1] sm:$0x3]  }
   0xa   :  { %v6_v2 = vld [vmem:[#allocation1] sm:$0x3]   ;;  %10 = vrot.lane.b32.xlu0 %v9_v1, %s28_s0 }
   0xb   :  { %8 = vst.msk [vmem:[#allocation0] ss:$8 sm:$0x3] %vm7_vm0, %v6_v2  }
  0x7c   :  { %v11_v3 = vpop.permute.xlu0 %10  }
  0x7d   :  { %14 = vst.msk [vmem:[#allocation0 + $0x1] ss:$8 sm:$0x3] %vm7_vm0, %v11_v3  }
  0x84   :  { %v18_v4 = vld [vmem:[#allocation0] sm:$0x3]  ;;  %v22_v5 = vld [vmem:[#allocation0 + $0x8] sm:$0x3] }
  0x85   :  { %20 = vst [vmem:[%s49_s1] sm:$0x3] %v18_v4  ;;  %26 = vst [vmem:[%s49_s1 + $0x2] sm:$0x3] %v22_v5 }

// kernel: split.0
= control target key start
LH: loop header
LB: loop body
LE: loop exit
PB: predicated region body
PF: predicated region fallthrough
CT: control target
= control target key end

     0   :  { %s26_s0 = inlined_call_operand.vmem [shape: f32[2,336], index: 0, kind: input, shape index: {}]   ;;  %s27_s1 = inlined_call_operand.vmem [shape: f32[2,144], index: 1, kind: output, shape index: {}]  }
   0x1   :  { %v2_v0 = vld [vmem:[%s26_s0] sm:$0xf]  }
   0x2   :  { %3 = vst [vmem:[%s27_s1] sm:$0xf] %v2_v0  }

// kernel: split.3
= control target key start
LH: loop header
LB: loop body
LE: loop exit
PB: predicated region body
PF: predicated region fallthrough
CT: control target
= control target key end

     0   :  { %v8_v0 = vlaneseq  ;;  %s39_s0 = inlined_call_operand.vmem [shape: f32[2,336], index: 0, kind: input, shape index: {}]   ;;  %s40_s1 = inlined_call_operand.vmem [shape: f32[2,128], index: 1, kind: output, shape index: {}]  }
   0x1   :  { %v16_v1 = vld [vmem:[%s39_s0 + $0x2] sm:$0x3]  ;;  %v17_v2 = vld [vmem:[%s39_s0 + $0x4] sm:$0x3]  ;;  %s19_s0 = smov 80  }
   0x2   :  { %v9_v3 = vand.u32 127, %v8_v0 }
   0x4   :  { %vm10_vm0 = vcmp.lt.s32.totalorder %v9_v3, 48 }
   0x5   :  { %v11_v4 = vsel %vm10_vm0, %v17_v2, %v16_v1 }
   0x6   :  { %12 = vrot.lane.b32.xlu0 %v11_v4, %s19_s0 }
  0x78   :  { %v13_v5 = vpop.permute.xlu0 %12 }
  0x79   :  { %14 = vst [vmem:[%s40_s1] sm:$0x3] %v13_v5 }

// kernel: encoder_forward.1
= control target key start
LH: loop header
LB: loop body
LE: loop exit
PB: predicated region body
PF: predicated region fallthrough
CT: control target
= control target key end

     0   :  { %s2508_s12 = smov 0   ;;  %s3110_s0 = inlined_call_operand.vmem [shape: f32[2,8,32], index: 0, kind: input, shape index: {}]   ;;  %s3111_s1 = inlined_call_operand.vmem [shape: f32[2,208,8], index: 1, kind: input, shape index: {}]   ;;  %s3112_s2 = inlined_call_operand.vmem [shape: f32[648,128], index: 2, kind: input, shape index: {}]   ;;  %s3113_s3 = inlined_call_operand.vmem [shape: f32[2,8,64], index: 3, kind: output, shape index: {}]  }
   0x1 LB: > { %s2043_s13 = sadd.s32 4294967295, %s2472_s12   ;;  %p2047_p0 = scmp.ge.s32.totalorder %s2472_s12, 1  ;;  %s2472_s12 = sphi %s2508_s12, %s13_s12  }
   0x2   : > { %p146_p1 = scmp.lt.s32.totalorder %s2472_s12, 3 }
   0x4   : > { %p147_p2 = pnand %p2047_p0, %p146_p1 }
   0x5   : > { %p173_p3 = scmp.lt.s32.totalorder (!%p147_p2), %s2043_s13, 1  ;;  %v207_v0 = vld [vmem:[%s3112_s2 + $0x18] sm:$0xff] (!%p147_p2)  ;;  %v208_v1 = vld [vmem:[%s3112_s2 + $0x20] sm:$0xff] (!%p147_p2)  ;;  %v209_v2 = vld [vmem:[%s3112_s2 + $0x28] sm:$0xff] (!%p147_p2)  ;;  %v2474_v3 = vmov (!%p147_p2), 0.0   ;;  %vm2475_vm0 = vmmov (!%p147_p2), 0  }
   0x6   : > { %150 = sbr.rel (%p147_p2) target bundleno = 8261 (0x2045), region = 32  ;;  %2180 = vmatprep.subr.bf16.mxu0 (!%p147_p2), %v2474_v3  ;;  %v220_v4 = vpack.c.bf16 (!%p147_p2), %v208_v1, %v207_v0  ;;  %v210_v5 = vld [vmem:[%s3112_s2 + $0x30] sm:$0xff] (!%p147_p2)  ;;  %2196 = vmatprep.subr.bf16.mxu1 (!%p147_p2), %v2474_v3  ;;  %v211_v7 = vld [vmem:[%s3112_s2 + $0x38] sm:$0xff] (!%p147_p2)  ;;  %v212_v8 = vld [vmem:[%s3112_s2 + $0x40] sm:$0xff] (!%p147_p2)  ;;  %s2476_s30 = smov (!%p147_p2), 32   ;;  %vm202_vm1 = vcmask (!%p147_p2), 261120  }
   0x7   : > { %v221_v6 = vpack.c.bf16 (!%p147_p2), %v210_v5, %v209_v2  ;;  %2192 = vmatprep.mubr.msk.bf16.mxu0 (!%p147_p2), %vm2475_vm0, %v2474_v3  ;;  %2208 = vmatprep.mubr.msk.bf16.mxu1 (!%p147_p2), %vm2475_vm0, %v2474_v3  ;;  %v222_v11 = vpack.c.bf16 (!%p147_p2), %v212_v8, %v211_v7  ;;  %v213_v12 = vld [vmem:[%s3112_s2 + $0x48] sm:$0xff] (!%p147_p2)  ;;  %v214_v13 = vld [vmem:[%s3112_s2 + $0x50] sm:$0xff] (!%p147_p2)  ;;  %s2477_s8 = smov (!%p147_p2), 64   ;;  %v215_v15 = vld [vmem:[%s3112_s2 + $0x58] sm:$0xff] (!%p147_p2)  ;;  %vm204_vm2 = vcmask (!%p147_p2), 523264   ;;  %vm231_vm3 = vcmask (!%p147_p2), 785408  }
   0x8   : > { %2181 = vmatpush3.bf16.msra.mxu0 (!%p147_p2), %v220_v4  ;;  %v223_v14 = vpack.c.bf16 (!%p147_p2), %v214_v13, %v213_v12  ;;  %v216_v16 = vld [vmem:[%s3112_s2 + $0x60] sm:$0xff] (!%p147_p2)  ;;  %v217_v18 = vld [vmem:[%s3112_s2 + $0x68] sm:$0xff] (!%p147_p2)  ;;  %v218_v19 = vld [vmem:[%s3112_s2 + $0x70] sm:$0xff] (!%p147_p2)  ;;  %s2479_s6 = smov (!%p147_p2), 96   ;;  %vm510_vm4 = vcmask (!%p147_p2), 130048   ;;  %vm563_vm5 = vcmask (!%p147_p2), 64512  }
   0x9   : > { %2182 = vmatprep.subr.bf16.mxu0 (!%p147_p2), %v2474_v3  ;;  %v224_v17 = vpack.c.bf16 (!%p147_p2), %v216_v16, %v215_v15  ;;  %v225_v20 = vpack.c.bf16 (!%p147_p2), %v218_v19, %v217_v18  ;;  %v2582_v23 = vld [vmem:[%s3112_s2 + $0x8] sm:$0xff] (!%p147_p2)  ;;  %v299_v29 = vld [vmem:[%s3112_s2 + $0x80] sm:$0xff] (!%p147_p2)  ;;  %v301_v31 = vld [vmem:[%s3112_s2 + $0x90] sm:$0xff] (!%p147_p2)  ;;  %s2480_s7 = smov (!%p147_p2), 80   ;;  %s2481_s9 = smov (!%p147_p2), 112   ;;  %vm587_vm6 = vcmask (!%p147_p2), 1043456  }
   0xa   : > { %v300_v30 = vld [vmem:[%s3112_s2 + $0x88] sm:$0xff] (!%p147_p2)  ;;  %v302_v33 = vld [vmem:[%s3112_s2 + $0x98] sm:$0xff] (!%p147_p2)  ;;  %v303_v35 = vld [vmem:[%s3112_s2 + $0xa0] sm:$0xff] (!%p147_p2)  ;;  %s2482_s17 = smov (!%p147_p2), 48   ;;  %s2483_s21 = smov (!%p147_p2), 8   ;;  %vm987_vm7 = vcmask (!%p147_p2), 195584  }
   0xb   : > { %v312_v32 = vpack.c.bf16 (!%p147_p2), %v300_v30, %v299_v29  ;;  %v313_v34 = vpack.c.bf16 (!%p147_p2), %v302_v33, %v301_v31  ;;  %v304_v36 = vld [vmem:[%s3112_s2 + $0xa8] sm:$0xff] (!%p147_p2)  ;;  %v305_v38 = vld [vmem:[%s3112_s2 + $0xb0] sm:$0xff] (!%p147_p2)  ;;  %v306_v39 = vld [vmem:[%s3112_s2 + $0xb8] sm:$0xff] (!%p147_p2)  ;;  %s2484_s23 = smov (!%p147_p2), 16   ;;  %s2485_s24 = smov (!%p147_p2), 40   ;;  %vm990_vm8 = vcmask (!%p147_p2), 326656  }
   0xc   : > { %2183 = vmatpush3.bf16.msra.mxu0 (!%p147_p2), %v221_v6  ;;  %v314_v37 = vpack.c.bf16 (!%p147_p2), %v304_v36, %v303_v35  ;;  %v315_v40 = vpack.c.bf16 (!%p147_p2), %v306_v39, %v305_v38  ;;  %v2051_v41 = vld [vmem:[%s3112_s2 + $0x78] ss:$0 sm:$0xff] (!%p147_p2)  ;;  %v307_v56 = vld [vmem:[%s3112_s2 + $0xc0] sm:$0xff] (!%p147_p2)  ;;  %v308_v57 = vld [vmem:[%s3112_s2 + $0xc8] sm:$0xff] (!%p147_p2)  ;;  %s2486_s25 = smov (!%p147_p2), 24   ;;  %s2487_s26 = smov (!%p147_p2), 56  }
   0xd   : > { %s3115_s13 = smov (!%p173_p3, %s2043_s13), 1  ;;  %2184 = vmatprep.subr.bf16.mxu0 %v2474_v3  ;;  %2197 = vmatpush3.bf16.msra.mxu1 %v312_v32  ;;  %v316_v58 = vpack.c.bf16 %v308_v57, %v307_v56  ;;  %v309_v59 = vld [vmem:[%s3112_s2 + $0xd0] sm:$0xff]  ;;  %v310_v60 = vld [vmem:[%s3112_s2 + $0xd8] sm:$0xff]  ;;  %v2053_v18 = vld [vmem:[%s3112_s2 + $0xe0] ss:$0 sm:$0xff]  ;;  %vm992_vm9 = vcmask 392192  }
   0xe   : > { %s2048_s22 = sshll.u32 %s3115_s13, 3  ;;  %2198 = vmatprep.subr.bf16.mxu1 %v2474_v3  ;;  %v317_v61 = vpack.c.bf16 %v310_v60, %v309_v59  ;;  %s2394_s4 = smul.u32 208, %s3115_s13  ;;  %v379_v13 = vld [vmem:[%s3112_s2 + $0xf8] sm:$0xff]  ;;  %v441_v36 = vld [vmem:[%s3112_s2 + $0x110] sm:$0xff]  ;;  %v443_v39 = vld [vmem:[%s3112_s2 + $0x120] sm:$0xff]  ;;  %vm994_vm10 = vcmask 457728  }
   0xf   : > { %s176_s29 = scalar_lea.vmem %s3110_s0, %s2048_s22  ;;  %vm1008_vm11 = vcmask 588800   ;;  %vm579_vm12 = vcmask 326912   ;;  %vm744_vm13 = vcmask 392512   ;;  %vm1320_vm14 = vcmask 458112  }
  0x10   : > { %v2549_v9 = vld [vmem:[%s176_s29] sm:$0xff]  ;;  %2185 = vmatpush3.bf16.msra.mxu0 %v222_v11  ;;  %v378_v11 = vld [vmem:[%s3112_s2 + $0xf0] sm:$0xff]  ;;  %s2660_s14 = scalar_lea.vmem %s3111_s1, %s2394_s4  ;;  %s3070_s4 = scalar_lea.vmem %s3113_s3, %s2048_s22  ;;  %vm1484_vm15 = vcmask 523712  }
  0x11   : > { %195 = vrot.lane.b32.xlu0 %v2549_v9, %s2476_s30  ;;  %v193_v10 = vrot.slane %v2549_v9, 1  ;;  %2186 = vmatprep.subr.bf16.mxu0 %v2474_v3  ;;  %v192_v22 = vrot.slane %v2549_v9, 7  ;;  %v188_v16 = vld [vmem:[%s2660_s14] sm:$0xff] }
  0x12   : > { %2199 = vmatpush3.bf16.msra.mxu1 %v313_v34 }
  0x13   : > { %2200 = vmatprep.subr.bf16.mxu1 %v2474_v3 }
  0x14   : > { %2187 = vmatpush3.bf16.msra.mxu0 %v223_v14  ;;  %v380_v14 = vld [vmem:[%s3112_s2 + $0x100] sm:$0xff] }
  0x15   : > { %199 = vrot.lane.b32.xlu0 %v193_v10, %s2477_s8  ;;  %2188 = vmatprep.subr.bf16.mxu0 %v2474_v3  ;;  %v377_v10 = vld [vmem:[%s3112_s2 + $0xe8] sm:$0xff]  ;;  %v383_v15 = vpack.c.bf16 %v380_v14, %v379_v13 }
  0x16   : > { %2201 = vmatpush3.bf16.msra.mxu1 %v314_v37  ;;  %v382_v12 = vpack.c.bf16 %v378_v11, %v377_v10  ;;  %v442_v37 = vld [vmem:[%s3112_s2 + $0x118] sm:$0xff] }
  0x17   : > { %2202 = vmatprep.subr.bf16.mxu1 %v2474_v3  ;;  %v446_v38 = vpack.c.bf16 %v442_v37, %v441_v36 }
  0x18   : > { %2189 = vmatpush3.bf16.msra.mxu0 %v224_v17  ;;  %v2478_v17 = vmov 0  }
  0x19   : > { %2190 = vmatprep.subr.bf16.mxu0 %v2474_v3  ;;  %2417 = vset.pattern.permute.xlu0 %v2478_v17 }
  0x1a   : > { %2203 = vmatpush3.bf16.msra.mxu1 %v315_v40  ;;  %435 = vperm.xlu0 %2417, %v188_v16   ;;  %v444_v40 = vld [vmem:[%s3112_s2 + $0x128] sm:$0xff] }
  0x1b   : > { %2204 = vmatprep.subr.bf16.mxu1 %v2474_v3 }
  0x1c   : > { %2191 = vmatpush3.bf16.msra.mxu0 %v225_v20 }
  0x1d   : > { %2212 = vmatprep.subr.bf16.mxu0 %v2474_v3 }
  0x1e   : > { %2205 = vmatpush3.bf16.msra.mxu1 %v316_v58 }
  0x1f   : > { %2206 = vmatprep.subr.bf16.mxu1 %v2474_v3 }
  0x22   : > { %2207 = vmatpush3.bf16.msra.mxu1 %v317_v61 }
  0x23   : > { %2220 = vmatprep.subr.bf16.mxu1 %v2474_v3 }
  0x83   : > { %v196_v21 = vpop.permute.xlu0 %195 }
  0x84   : > { %v203_v24 = vsel %vm202_vm1, %v192_v22, %v196_v21 }
  0x87   : > { %v200_v25 = vpop.permute.xlu0 %199 }
  0x88   : > { %v205_v26 = vsel %vm204_vm2, %v203_v24, %v200_v25 }
  0x89   : > { %v206_v27 = vmul.f32 %v205_v26, %v2582_v23 }
  0x8b   : > { %v219_v28 = vpack.c.bf16 %v206_v27, %v206_v27 }
  0x8d   : > { %2193 = vmatmul.mubr.msk.bf16.vlgmr.msra.gmra.mrb[0].mxu0 %vm231_vm3, %v219_v28 }
  0x8e   : > { %2216 = vmatprep.mubr.msk.bf16.mxu0 %vm2475_vm0, %v2474_v3  ;;  %2213 = vmatpush3.bf16.msra.mxu0 %v382_v12 }
  0x8f   : > { %2214 = vmatprep.subr.bf16.mxu0 %v2474_v3 }
  0x92   : > { %2215 = vmatpush3.bf16.msra.mxu0 %v383_v15 }
  0x93   : > { %2228 = vmatprep.subr.bf16.mxu0 %v2474_v3 }
 0x160   : > { %v269_v42 = vpop.f32.mrb[0].mxu0 }
 0x161   : > { %v270_v43 = vadd.f32 %v2051_v41, %v269_v42  ;;  %v2194_v44 = vpop.f32.mrb[1].mxu0  ;;  %v447_v41 = vpack.c.bf16 %v444_v40, %v443_v39  ;;  %v2055_v42 = vld [vmem:[%s3112_s2 + $0x108] ss:$0 sm:$0xff] }
 0x162   : > { %v272_v45 = vpop.f32.mrb[2].mxu0 }
 0x163   : > { %v275_v46 = vand.u32 2147483647, %v270_v43  ;;  %v2195_v47 = vpop.f32.mrb[3].mxu0  ;;  %v282_v54 = vmax.f32 %v270_v43, 0.0 }
 0x164   : > { %v2687_v47 = vpop.permute.xlu0 %435 }
 0x165   : > { %v276_v48 = vsub.f32 0.0, %v275_v46 }
 0x167   : > { %v277_v49 = vmul.f32 1.442695, %v276_v48 }
 0x169   : > { %2418 = vpow2.f32 %v277_v49 }
 0x173   : > { %v2419_v50 = vpop.eup %2418 }
 0x174   : > { %v279_v51 = vadd.f32 1.0, %v2419_v50  ;;  %v439_v50 = vld [vmem:[%s3112_s2] sm:$0xff] }
 0x176   : > { %2420 = vlog2.f32 %v279_v51 }
 0x180   : > { %v2421_v52 = vpop.eup %2420 }
 0x181   : > { %v281_v53 = vmul.f32 0.6931472, %v2421_v52 }
 0x183   : > { %v283_v55 = vadd.f32 %v282_v54, %v281_v53 }
 0x185   : > { %2422 = vtanh.f32 %v283_v55 }
 0x18f   : > { %v2423_v62 = vpop.eup %2422 }
 0x190   : > { %v285_v63 = vmul.f32 %v2423_v62, %v270_v43 }
 0x192   : > { %289 = vrot.lane.b32.xlu1 %v285_v63, %s2476_s30  ;;  %v287_v0 = vrot.slane %v285_v63, 1  ;;  %v286_v2 = vrot.slane %v285_v63, 7  ;;  %v2715_v63 = vld [vmem:[%s2660_s14 + $0x8] ss:$0 sm:$0xff] }
 0x196   : > { %293 = vrot.lane.b32.xlu1 %v287_v0, %s2477_s8 }
 0x204   : > { %v290_v1 = vpop.permute.xlu1 %289 }
 0x205   : > { %v296_v4 = vsel %vm202_vm1, %v286_v2, %v290_v1 }
 0x208   : > { %v294_v5 = vpop.permute.xlu1 %293 }
 0x209   : > { %v297_v6 = vsel %vm204_vm2, %v296_v4, %v294_v5 }
 0x20a   : > { %v298_v7 = vmul.f32 %v297_v6, %v2582_v23 }
 0x20c   : > { %v311_v8 = vpack.c.bf16 %v298_v7, %v298_v7 }
 0x20e   : > { %2209 = vmatmul.mubr.msk.bf16.vlgmr.msra.gmra.mrb[0].mxu1 %vm231_vm3, %v311_v8 }
 0x20f   : > { %2224 = vmatprep.mubr.msk.bf16.mxu1 %vm2475_vm0, %v2474_v3  ;;  %2221 = vmatpush3.bf16.msra.mxu1 %v446_v38 }
 0x210   : > { %2222 = vmatprep.subr.bf16.mxu1 %v2474_v3 }
 0x213   : > { %2223 = vmatpush3.bf16.msra.mxu1 %v447_v41 }
 0x214   : > { %2234 = vmatprep.subr.bf16.mxu1 %v2474_v3 }
 0x2e1   : > { %v360_v19 = vpop.f32.mrb[0].mxu1 }
 0x2e2   : > { %v361_v20 = vadd.f32 %v2053_v18, %v360_v19  ;;  %v2210_v21 = vpop.f32.mrb[1].mxu1 }
 0x2e3   : > { %v363_v22 = vpop.f32.mrb[2].mxu1 }
 0x2e4   : > { %v366_v23 = vand.u32 2147483647, %v361_v20  ;;  %v2211_v24 = vpop.f32.mrb[3].mxu1  ;;  %v373_v31 = vmax.f32 %v361_v20, 0.0  ;;  %v496_v22 = vld [vmem:[%s3112_s2 + $0x138] sm:$0xff] }
 0x2e6   : > { %v367_v25 = vsub.f32 0.0, %v366_v23  ;;  %v497_v23 = vld [vmem:[%s3112_s2 + $0x140] sm:$0xff] }
 0x2e7   : > { %v632_v24 = vpack.c.bf16 %v497_v23, %v496_v22 }
 0x2e8   : > { %v368_v26 = vmul.f32 1.442695, %v367_v25 }
 0x2ea   : > { %2424 = vpow2.f32 %v368_v26 }
 0x2f4   : > { %v2425_v27 = vpop.eup %2424 }
 0x2f5   : > { %v370_v28 = vadd.f32 1.0, %v2425_v27 }
 0x2f7   : > { %2426 = vlog2.f32 %v370_v28 }
 0x301   : > { %v2427_v29 = vpop.eup %2426 }
 0x302   : > { %v372_v30 = vmul.f32 0.6931472, %v2427_v29 }
 0x304   : > { %v374_v32 = vadd.f32 %v373_v31, %v372_v30 }
 0x306   : > { %2428 = vtanh.f32 %v374_v32 }
 0x310   : > { %v2429_v33 = vpop.eup %2428 }
 0x311   : > { %v376_v34 = vmul.f32 %v2429_v33, %v361_v20 }
 0x313   : > { %v381_v35 = vpack.c.bf16 %v376_v34, %v376_v34 }
 0x315   : > { %2217 = vmatmul.mubr.msk.bf16.vlgmr.msra.gmra.mrb[4].mxu0 %vm202_vm1, %v381_v35 }
 0x316   : > { %2230 = vmatprep.mubr.msk.bf16.mxu0 %vm2475_vm0, %v2474_v3 }
 0x3e8   : > { %v426_v43 = vpop.f32.mrb[4].mxu0 }
 0x3e9   : > { %v427_v44 = vadd.f32 %v2055_v42, %v426_v43  ;;  %v2218_v45 = vpop.f32.mrb[5].mxu0 }
 0x3ea   : > { %v429_v46 = vpop.f32.mrb[6].mxu0  ;;  %v498_v45 = vld [vmem:[%s3112_s2 + $0x148] sm:$0xff] }
 0x3eb   : > { %v432_v48 = vadd.f32 %v427_v44, %v2549_v9  ;;  %v2219_v49 = vpop.f32.mrb[7].mxu0  ;;  %v2057_v9 = vld [vmem:[%s3112_s2 + $0x130] ss:$0 sm:$0xff] }
 0x3ec   : > { %v499_v46 = vld [vmem:[%s3112_s2 + $0x150] sm:$0xff] }
 0x3ed   : > { %v438_v51 = vmul.f32 %v2687_v47, %v432_v48 }
 0x3ef   : > { %v2694_v52 = vadd.f32 %v439_v50, %v438_v51  ;;  %v796_v50 = vpack.c.bf16 %v499_v46, %v498_v45  ;;  %v871_v45 = vld [vmem:[%s2660_s14 + $0x28] sm:$0xff] }
 0x3f1   : > { %v445_v53 = vpack.c.bf16 %v2694_v52, %v2694_v52 }
 0x3f3   : > { %2225 = vmatmul.mubr.msk.bf16.vlgmr.msra.gmra.mrb[4].mxu1 %vm202_vm1, %v445_v53 }
 0x3f4   : > { %2236 = vmatprep.mubr.msk.bf16.mxu1 %vm2475_vm0, %v2474_v3 }
 0x4c6   : > { %v490_v54 = vpop.f32.mrb[4].mxu1 }
 0x4c7   : > { %v491_v55 = vadd.f32 %v2057_v9, %v490_v54  ;;  %v2226_v56 = vpop.f32.mrb[5].mxu1 }
 0x4c8   : > { %v493_v57 = vpop.f32.mrb[6].mxu1 }
 0x4c9   : > { %v2704_v58 = vpack.c.bf16 %v491_v55, %v491_v55  ;;  %v2227_v59 = vpop.f32.mrb[7].mxu1  ;;  %v2059_v57 = vld [vmem:[%s3112_s2 + $0x158] ss:$0 sm:$0xff] }
 0x4cb   : > { %508 = vrot.lane.b32.xlu1 %v2704_v58, %s2479_s6 }
 0x53d   : > { %v509_v60 = vpop.permute.xlu1 %508 }
 0x53e   : > { %v515_v61 = vsel %vm510_vm4, %v509_v60, 0 }
 0x53f   : > { %2229 = vmatpush3.bf16.xpose.msra.mxu0 %v515_v61 }
 0x540   : > { %2240 = vmatprep.subr.bf16.mxu0 %v2474_v3 }
 0x546   : > { %2231 = vmatmul.mubr.msk.bf16.vlgmr.msra.gmra.mrb[8].mxu0 %vm510_vm4, %v2704_v58 }
 0x547   : > { %2242 = vmatprep.mubr.msk.bf16.mxu0 %vm2475_vm0, %v2474_v3  ;;  %2241 = vmatpush3.bf16.msra.mxu0 %v632_v24 }
 0x548   : > { %2252 = vmatprep.subr.bf16.mxu0 %v2474_v3 }
 0x619   : > { %v551_v62 = vpop.f32.mrb[8].mxu0 }
 0x61a   : > { %v557_v0 = vmul.f32 0.25, %v551_v62  ;;  %v2232_v1 = vpop.f32.mrb[9].mxu0 }
 0x61b   : > { %v554_v2 = vpop.f32.mrb[10].mxu0 }
 0x61c   : > { %v2233_v4 = vpop.f32.mrb[11].mxu0  ;;  %v562_v5 = vadd.f32 %v2715_v63, %v557_v0 }
 0x61e   : > { %v564_v6 = vsel %vm563_vm5, %v562_v5, -inf }
 0x61f   : > { %565 = vmax.xlane.f32.xlu1 %v564_v6 }
 0x630   : > { %679 = vrot.lane.b32.xlu1 %v2704_v58, %s2480_s7 }
 0x634   : > { %677 = vrot.lane.b32.xlu1 %v2704_v58, %s2481_s9 }
 0x6ac   : > { %v566_v7 = vpop.xlane.xlu1 %565 }
 0x6ad   : > { %v567_v8 = vsub.f32 %v562_v5, %v566_v7 }
 0x6af   : > { %v568_v10 = vmul.f32 1.442695, %v567_v8  ;;  %v880_v8 = vld [vmem:[%s3112_s2 + $0x170] sm:$0xff] }
 0x6b0   : > { %v680_v18 = vpop.permute.xlu1 %679 }
 0x6b1   : > { %2430 = vpow2.f32 %v568_v10  ;;  %v685_v20 = vsel %vm510_vm4, %v680_v18, 0 }
 0x6b4   : > { %v678_v21 = vpop.permute.xlu1 %677 }
 0x6bb   : > { %v2431_v11 = vpop.eup %2430 }
 0x6bc   : > { %v570_v12 = vsel %vm563_vm5, %v2431_v11, 0.0 }
 0x6bd   : > { %571 = vadd.xlane.f32.xlu0 %v570_v12  ;;  %v883_v12 = vld [vmem:[%s3112_s2 + $0x188] sm:$0xff] }
 0x6d3   : > { %582 = vrot.lane.b32.xlu0 %v2704_v58, %s2477_s8 }
 0x74a   : > { %v572_v13 = vpop.xlane.xlu0 %571 }
 0x74b   : > { %2432 = vrcp.f32 %v572_v13 }
 0x74e   : > { %v583_v14 = vpop.permute.xlu0 %582 }
 0x74f   : > { %v589_v15 = vsel %vm587_vm6, %v583_v14, 0 }
 0x750   : > { %2235 = vmatpush3.bf16.msra.mxu1 %v589_v15 }
 0x751   : > { %2246 = vmatprep.subr.bf16.mxu1 %v2474_v3 }
 0x755   : > { %v2433_v16 = vpop.eup %2432 }
 0x756   : > { %v2728_v17 = vmul.f32 %v2433_v16, %v2431_v11  ;;  %v882_v11 = vld [vmem:[%s3112_s2 + $0x180] sm:$0xff] }
 0x757   : > { %v886_v13 = vpack.c.bf16 %v883_v12, %v882_v11 }
 0x758   : > { %v581_v19 = vpack.c.bf16 %v2728_v17, %v2728_v17 }
 0x75a   : > { %2237 = vmatmul.mubr.msk.bf16.vlgmr.msra.gmra.mrb[8].mxu1 %vm563_vm5, %v581_v19  ;;  %v2067_v19 = vld [vmem:[%s3112_s2 + $0x160] ss:$0 sm:$0xff] }
 0x75b   : > { %2247 = vmatpush3.bf16.xpose.msra.mxu1 %v685_v20  ;;  %2248 = vmatprep.mubr.msk.bf16.mxu1 %vm2475_vm0, %v2474_v3 }
 0x75c   : > { %2264 = vmatprep.subr.bf16.mxu1 %v2474_v3 }
 0x762   : > { %2249 = vmatmul.mubr.msk.bf16.vlgmr.msra.gmra.mrb[12].mxu1 %vm510_vm4, %v678_v21  ;;  %v2068_v21 = vld [vmem:[%s3112_s2 + $0x168] ss:$0 sm:$0xff] }
 0x763   : > { %2268 = vmatprep.mubr.msk.bf16.mxu1 %vm2475_vm0, %v2474_v3 }
 0x82d   : > { %v625_v25 = vpop.f32.mrb[8].mxu1 }
 0x82e   : > { %v631_v26 = vpack.c.bf16 %v625_v25, %v625_v25  ;;  %v2238_v27 = vpop.f32.mrb[9].mxu1 }
 0x82f   : > { %v628_v28 = vpop.f32.mrb[10].mxu1 }
 0x830   : > { %v2239_v29 = vpop.f32.mrb[11].mxu1  ;;  %2243 = vmatmul.mubr.msk.bf16.vlgmr.msra.gmra.mrb[12].mxu0 %vm510_vm4, %v631_v26  ;;  %v2069_v26 = vld [vmem:[%s3112_s2 + $0x190] ss:$0 sm:$0xff] }
 0x831   : > { %2254 = vmatprep.mubr.msk.bf16.mxu0 %vm2475_vm0, %v2474_v3 }
 0x835   : > { %v721_v30 = vpop.f32.mrb[12].mxu1 }
 0x836   : > { %v727_v31 = vmul.f32 0.25, %v721_v30  ;;  %v2250_v32 = vpop.f32.mrb[13].mxu1 }
 0x837   : > { %v724_v33 = vpop.f32.mrb[14].mxu1 }
 0x838   : > { %v2251_v34 = vpop.f32.mrb[15].mxu1  ;;  %v728_v35 = vadd.f32 %v2715_v63, %v727_v31 }
 0x83a   : > { %v729_v36 = vsel %vm563_vm5, %v728_v35, -inf }
 0x83b   : > { %730 = vmax.xlane.f32.xlu0 %v729_v36 }
 0x851   : > { %747 = vrot.lane.b32.xlu0 %v2704_v58, %s2482_s17  ;;  %v505_v58 = vadd.f32 %v2059_v57, %v2694_v52  ;;  %v881_v52 = vld [vmem:[%s3112_s2 + $0x178] sm:$0xff] }
 0x852   : > { %v885_v10 = vpack.c.bf16 %v881_v52, %v880_v8 }
 0x854   : > { %2265 = vmatpush3.bf16.msra.mxu1 %v885_v10 }
 0x855   : > { %2266 = vmatprep.subr.bf16.mxu1 %v2474_v3 }
 0x858   : > { %2267 = vmatpush3.bf16.msra.mxu1 %v886_v13 }
 0x859   : > { %2272 = vmatprep.subr.bf16.mxu1 %v2474_v3 }
 0x8c8   : > { %v731_v37 = vpop.xlane.xlu0 %730 }
 0x8c9   : > { %v732_v38 = vsub.f32 %v728_v35, %v731_v37 }
 0x8cb   : > { %v733_v39 = vmul.f32 1.442695, %v732_v38 }
 0x8cc   : > { %v748_v40 = vpop.permute.xlu0 %747 }
 0x8cd   : > { %2434 = vpow2.f32 %v733_v39  ;;  %v753_v41 = vsel %vm587_vm6, %v748_v40, 0 }
 0x8ce   : > { %2253 = vmatpush3.bf16.msra.mxu0 %v753_v41  ;;  %v868_v41 = vld [vmem:[%s2660_s14 + $0x10] sm:$0xff] }
 0x8cf   : > { %2258 = vmatprep.subr.bf16.mxu0 %v2474_v3 }
 0x8d7   : > { %v2435_v42 = vpop.eup %2434 }
 0x8d8   : > { %v735_v43 = vsel %vm563_vm5, %v2435_v42, 0.0 }
 0x8d9   : > { %736 = vadd.xlane.f32.xlu1 %v735_v43 }
 0x966   : > { %v737_v44 = vpop.xlane.xlu1 %736 }
 0x967   : > { %2436 = vrcp.f32 %v737_v44  ;;  %v870_v44 = vld [vmem:[%s2660_s14 + $0x20] sm:$0xff] }
 0x968   : > { %v1000_v46 = vpack.c.bf16 %v871_v45, %v870_v44 }
 0x971   : > { %v2437_v48 = vpop.eup %2436 }
 0x972   : > { %v2763_v49 = vmul.f32 %v2437_v48, %v2435_v42  ;;  %v869_v42 = vld [vmem:[%s2660_s14 + $0x18] sm:$0xff]  ;;  %v872_v48 = vld [vmem:[%s2660_s14 + $0x30] sm:$0xff] }
 0x973   : > { %v999_v43 = vpack.c.bf16 %v869_v42, %v868_v41 }
 0x974   : > { %v746_v51 = vpack.c.bf16 %v2763_v49, %v2763_v49 }
 0x976   : > { %2255 = vmatmul.mubr.msk.bf16.vlgmr.msra.gmra.mrb[16].mxu0 %vm563_vm5, %v746_v51 }
 0x977   : > { %2259 = vmatpush3.bf16.msra.mxu0 %v796_v50  ;;  %2260 = vmatprep.mubr.msk.bf16.mxu0 %vm2475_vm0, %v2474_v3  ;;  %v873_v50 = vld [vmem:[%s2660_s14 + $0x38] sm:$0xff] }
 0x978   : > { %2286 = vmatprep.subr.bf16.mxu0 %v2474_v3  ;;  %v1001_v51 = vpack.c.bf16 %v873_v50, %v872_v48 }
 0xa49   : > { %v789_v53 = vpop.f32.mrb[16].mxu0 }
 0xa4a   : > { %v795_v9 = vpack.c.bf16 %v789_v53, %v789_v53  ;;  %v2256_v54 = vpop.f32.mrb[17].mxu0 }
 0xa4b   : > { %v792_v55 = vpop.f32.mrb[18].mxu0  ;;  %v874_v54 = vld [vmem:[%s2660_s14 + $0x40] sm:$0xff] }
 0xa4c   : > { %v2257_v56 = vpop.f32.mrb[19].mxu0  ;;  %2261 = vmatmul.mubr.msk.bf16.vlgmr.msra.gmra.mrb[12].mxu0 %vm510_vm4, %v795_v9  ;;  %v875_v55 = vld [vmem:[%s2660_s14 + $0x48] sm:$0xff] }
 0xa4d   : > { %2288 = vmatprep.mubr.msk.bf16.mxu0 %vm2475_vm0, %v2474_v3  ;;  %v1002_v57 = vpack.c.bf16 %v875_v55, %v874_v54 }
 0xb1f   : > { %v834_v59 = vpop.f32.mrb[12].mxu0 }
 0xb20   : > { %v2384_v60 = vadd.f32 %v834_v59, %v505_v58  ;;  %v2262_v61 = vpop.f32.mrb[13].mxu0  ;;  %v876_v59 = vld [vmem:[%s2660_s14 + $0x50] sm:$0xff] }
 0xb21   : > { %v837_v62 = vpop.f32.mrb[14].mxu0 }
 0xb22   : > { %v2263_v0 = vpop.f32.mrb[15].mxu0  ;;  %v843_v1 = vsel %vm202_vm1, %v2384_v60, 0.0 }
 0xb23   : > { %844 = vadd.xlane.f32.xlu1 %v843_v1 }
 0xbb0   : > { %v845_v2 = vpop.xlane.xlu1 %844 }
 0xbb1   : > { %v847_v4 = vmul.f32 0.03125, %v845_v2  ;;  %v878_v2 = vld [vmem:[%s2660_s14 + $0x60] sm:$0xff] }
 0xbb3   : > { %v848_v5 = vsub.f32 %v2384_v60, %v847_v4  ;;  %v1003_v60 = vpack.c.bf16 %v876_v59, %v876_v59  ;;  %v1056_v4 = vpack.c.bf16 %v878_v2, %v878_v2 }
 0xbb5   : > { %v849_v6 = vmul.f32 %v848_v5, %v848_v5  ;;  %v1013_v62 = vsel %vm587_vm6, %v1003_v60, 0 }
 0xbb7   : > { %v850_v7 = vsel %vm202_vm1, %v849_v6, 0.0  ;;  %v1065_v6 = vsel %vm587_vm6, %v1056_v4, 0 }
 0xbb8   : > { %851 = vadd.xlane.f32.xlu1 %v850_v7  ;;  %2287 = vmatpush3.bf16.msra.mxu0 %v1065_v6 }
 0xbb9   : > { %2292 = vmatprep.subr.bf16.mxu0 %v2474_v3 }
 0xc45   : > { %v852_v14 = vpop.xlane.xlu1 %851 }
 0xc46   : > { %v853_v15 = vmul.f32 0.03125, %v852_v14 }
 0xc48   : > { %v854_v16 = vadd.f32 1e-05, %v853_v15 }
 0xc4a   : > { %2438 = vrsqrt.f32 %v854_v16 }
 0xc54   : > { %v2439_v18 = vpop.eup %2438 }
 0xc55   : > { %v856_v20 = vmul.f32 %v2439_v18, %v848_v5 }
 0xc57   : > { %v861_v22 = vmul.f32 %v2067_v19, %v856_v20 }
 0xc59   : > { %v866_v23 = vadd.f32 %v2068_v21, %v861_v22  ;;  %v2846_v22 = vld [vmem:[%s3112_s2 + $0x10] sm:$0xff] }
 0xc5b   : > { %v2801_v24 = vmul.f32 %v866_v23, %v2687_v47 }
 0xc5d   : > { %v884_v25 = vpack.c.bf16 %v2801_v24, %v2801_v24 }
 0xc5f   : > { %2269 = vmatmul.mubr.msk.bf16.vlgmr.msra.gmra.mrb[16].mxu1 %vm202_vm1, %v884_v25 }
 0xc60   : > { %2282 = vmatprep.mubr.msk.bf16.mxu1 %vm2475_vm0, %v2474_v3  ;;  %2273 = vmatpush3.bf16.msra.mxu1 %v999_v43 }
 0xc61   : > { %2274 = vmatprep.subr.bf16.mxu1 %v2474_v3 }
 0xc64   : > { %2275 = vmatpush3.bf16.msra.mxu1 %v1000_v46  ;;  %v2075_v46 = vld [vmem:[%s3112_s2 + $0x1a0] ss:$0 sm:$0xff] }
 0xc65   : > { %2276 = vmatprep.subr.bf16.mxu1 %v2474_v3 }
 0xc68   : > { %2277 = vmatpush3.bf16.msra.mxu1 %v1001_v51 }
 0xc69   : > { %2278 = vmatprep.subr.bf16.mxu1 %v2474_v3 }
 0xc6c   : > { %2279 = vmatpush3.bf16.msra.mxu1 %v1002_v57 }
 0xc6d   : > { %2280 = vmatprep.subr.bf16.mxu1 %v2474_v3 }
 0xc70   : > { %2281 = vmatpush3.bf16.msra.mxu1 %v1013_v62  ;;  %v1189_v62 = vld [vmem:[%s3112_s2 + $0x1c0] sm:$0xff] }
 0xc71   : > { %2298 = vmatprep.subr.bf16.mxu1 %v2474_v3 }
 0xd32   : > { %v929_v27 = vpop.f32.mrb[16].mxu1 }
 0xd33   : > { %v930_v28 = vadd.f32 %v2069_v26, %v929_v27  ;;  %v2270_v29 = vpop.f32.mrb[17].mxu1 }
 0xd34   : > { %v932_v30 = vpop.f32.mrb[18].mxu1  ;;  %v1107_v29 = vld [vmem:[%s3112_s2 + $0x198] sm:$0xff] }
 0xd35   : > { %v935_v31 = vand.u32 2147483647, %v930_v28  ;;  %v2271_v32 = vpop.f32.mrb[19].mxu1  ;;  %v942_v39 = vmax.f32 %v930_v28, 0.0  ;;  %v2071_v30 = vld [vmem:[%s2660_s14 + $0x58] ss:$0 sm:$0xff] }
 0xd37   : > { %v936_v33 = vsub.f32 0.0, %v935_v31  ;;  %v1109_v31 = vpack.c.bf16 %v1107_v29, %v1107_v29 }
 0xd39   : > { %v937_v34 = vmul.f32 1.442695, %v936_v33 }
 0xd3b   : > { %2440 = vpow2.f32 %v937_v34 }
 0xd45   : > { %v2441_v35 = vpop.eup %2440 }
 0xd46   : > { %v939_v36 = vadd.f32 1.0, %v2441_v35 }
 0xd48   : > { %2442 = vlog2.f32 %v939_v36 }
 0xd52   : > { %v2443_v37 = vpop.eup %2442 }
 0xd53   : > { %v941_v38 = vmul.f32 0.6931472, %v2443_v37 }
 0xd55   : > { %v943_v40 = vadd.f32 %v942_v39, %v941_v38  ;;  %v1119_v38 = vsel %vm587_vm6, %v1109_v31, 0  ;;  %v2073_v39 = vld [vmem:[%s2660_s14 + $0x68] ss:$0 sm:$0xff] }
 0xd57   : > { %2444 = vtanh.f32 %v943_v40 }
 0xd61   : > { %v2445_v53 = vpop.eup %2444 }
 0xd62   : > { %v945_v9 = vmul.f32 %v2445_v53, %v930_v28 }
 0xd64   : > { %966 = vrot.lane.b32.xlu0 %v945_v9, %s2476_s30  ;;  %v947_v56 = vrot.slane %v945_v9, 5  ;;  %v948_v58 = vrot.slane %v945_v9, 6  ;;  %v950_v61 = vrot.slane %v945_v9, 1  ;;  %v949_v0 = vrot.slane %v945_v9, 7 }
 0xd65   : > { %v952_v1 = vrot.slane %v945_v9, 3  ;;  %v951_v5 = vrot.slane %v945_v9, 2  ;;  %v946_v7 = vrot.slane %v945_v9, 4 }
 0xd66   : > { %954 = vrot.lane.b32.xlu1 %v947_v56, %s2483_s21 }
 0xd68   : > { %958 = vrot.lane.b32.xlu0 %v948_v58, %s2484_s23 }
 0xd6a   : > { %970 = vrot.lane.b32.xlu1 %v950_v61, %s2485_s24  ;;  %v1188_v61 = vld [vmem:[%s3112_s2 + $0x1b8] sm:$0xff] }
 0xd6c   : > { %962 = vrot.lane.b32.xlu0 %v949_v0, %s2486_s25  ;;  %v1193_v0 = vpack.c.bf16 %v1189_v62, %v1188_v61 }
 0xd6e   : > { %978 = vrot.lane.b32.xlu1 %v952_v1, %s2487_s26  ;;  %v1191_v1 = vld [vmem:[%s3112_s2 + $0x1d0] sm:$0xff] }
 0xd70   : > { %974 = vrot.lane.b32.xlu0 %v951_v5, %s2482_s17 }
 0xd74   : > { %982 = vrot.lane.b32.xlu0 %v946_v7, %s2477_s8 }
 0xdd6   : > { %v967_v8 = vpop.permute.xlu0 %966 }
 0xdd8   : > { %v955_v52 = vpop.permute.xlu1 %954 }
 0xdd9   : > { %v985_v11 = vsel %vm563_vm5, %v946_v7, %v955_v52 }
 0xdda   : > { %v959_v10 = vpop.permute.xlu0 %958 }
 0xddb   : > { %v986_v12 = vsel %vm510_vm4, %v985_v11, %v959_v10  ;;  %v2078_v10 = vld [vmem:[%s3112_s2 + $0x1b0] ss:$0 sm:$0xff] }
 0xddc   : > { %v971_v14 = vpop.permute.xlu1 %970 }
 0xdde   : > { %v963_v13 = vpop.permute.xlu0 %962 }
 0xddf   : > { %v988_v15 = vsel %vm987_vm7, %v986_v12, %v963_v13 }
 0xde0   : > { %v989_v16 = vsel %vm202_vm1, %v988_v15, %v967_v8  ;;  %v979_v21 = vpop.permute.xlu1 %978  ;;  %v2077_v8 = vld [vmem:[%s3112_s2 + $0x1a8] ss:$0 sm:$0xff]  ;;  %v2079_v15 = vld [vmem:[%s3112_s2 + $0x1d8] ss:$0 sm:$0xff] }
 0xde1   : > { %v991_v18 = vsel %vm990_vm8, %v989_v16, %v971_v14 }
 0xde2   : > { %v975_v19 = vpop.permute.xlu0 %974 }
 0xde3   : > { %v993_v20 = vsel %vm992_vm9, %v991_v18, %v975_v19 }
 0xde4   : > { %v995_v25 = vsel %vm994_vm10, %v993_v20, %v979_v21 }
 0xde6   : > { %v983_v23 = vpop.permute.xlu0 %982 }
 0xde7   : > { %v996_v26 = vsel %vm204_vm2, %v995_v25, %v983_v23 }
 0xde8   : > { %v997_v27 = vmul.f32 %v996_v26, %v2846_v22 }
 0xdea   : > { %v998_v28 = vpack.c.bf16 %v997_v27, %v997_v27 }
 0xdec   : > { %2283 = vmatmul.mubr.msk.bf16.vlgmr.msra.gmra.mrb[20].mxu1 %vm1008_vm11, %v998_v28 }
 0xded   : > { %2302 = vmatprep.mubr.msk.bf16.mxu1 %vm2475_vm0, %v2474_v3  ;;  %2299 = vmatpush3.bf16.msra.mxu1 %v1193_v0 }
 0xdee   : > { %2300 = vmatprep.subr.bf16.mxu1 %v2474_v3 }
 0xebf   : > { %v1049_v32 = vpop.f32.mrb[20].mxu1 }
 0xec0   : > { %v1050_v33 = vadd.f32 %v2071_v30, %v1049_v32  ;;  %v2284_v34 = vpop.f32.mrb[21].mxu1 }
 0xec1   : > { %v1052_v35 = vpop.f32.mrb[22].mxu1 }
 0xec2   : > { %v1055_v36 = vpack.c.bf16 %v1050_v33, %v1050_v33  ;;  %v2285_v37 = vpop.f32.mrb[23].mxu1 }
 0xec4   : > { %2289 = vmatmul.mubr.msk.bf16.vlgmr.msra.gmra.mrb[20].mxu0 %vm563_vm5, %v1055_v36 }
 0xec5   : > { %2293 = vmatpush3.bf16.msra.mxu0 %v1119_v38  ;;  %2294 = vmatprep.mubr.msk.bf16.mxu0 %vm2475_vm0, %v2474_v3 }
 0xec6   : > { %2306 = vmatprep.subr.bf16.mxu0 %v2474_v3 }
 0xf97   : > { %v1101_v40 = vpop.f32.mrb[20].mxu0 }
 0xf98   : > { %v1102_v41 = vadd.f32 %v2073_v39, %v1101_v40  ;;  %v2290_v42 = vpop.f32.mrb[21].mxu0 }
 0xf99   : > { %v1104_v43 = vpop.f32.mrb[22].mxu0 }
 0xf9a   : > { %v1108_v44 = vpack.c.bf16 %v1102_v41, %v1102_v41  ;;  %v2291_v45 = vpop.f32.mrb[23].mxu0 }
 0xf9c   : > { %2295 = vmatmul.mubr.msk.bf16.vlgmr.msra.gmra.mrb[24].mxu0 %vm563_vm5, %v1108_v44 }
 0xf9d   : > { %2308 = vmatprep.mubr.msk.bf16.mxu0 %vm2475_vm0, %v2474_v3 }
0x106f   : > { %v1155_v48 = vpop.f32.mrb[24].mxu0 }
0x1070   : > { %v1156_v50 = vadd.f32 %v2075_v46, %v1155_v48  ;;  %v2296_v51 = vpop.f32.mrb[25].mxu0 }
0x1071   : > { %v1158_v53 = vpop.f32.mrb[26].mxu0  ;;  %v1244_v51 = vld [vmem:[%s3112_s2 + $0x1e8] sm:$0xff] }
0x1072   : > { %v2297_v9 = vpop.f32.mrb[27].mxu0  ;;  %v1161_v54 = vadd.f32 %v1156_v50, %v2801_v24  ;;  %v1190_v24 = vld [vmem:[%s3112_s2 + $0x1c8] sm:$0xff]  ;;  %v1243_v50 = vld [vmem:[%s3112_s2 + $0x1e0] sm:$0xff] }
0x1073   : > { %v1194_v2 = vpack.c.bf16 %v1191_v1, %v1190_v24  ;;  %v1372_v53 = vpack.c.bf16 %v1244_v51, %v1243_v50  ;;  %v2089_v51 = vld [vmem:[%s3112_s2 + $0x210] ss:$0 sm:$0xff] }
0x1074   : > { %v1164_v55 = vsel %vm202_vm1, %v1161_v54, 0.0 }
0x1075   : > { %1165 = vadd.xlane.f32.xlu1 %v1164_v55  ;;  %2301 = vmatpush3.bf16.msra.mxu1 %v1194_v2 }
0x1076   : > { %2312 = vmatprep.subr.bf16.mxu1 %v2474_v3 }
0x1102   : > { %v1166_v56 = vpop.xlane.xlu1 %1165 }
0x1103   : > { %v1167_v57 = vmul.f32 0.03125, %v1166_v56 }
0x1105   : > { %v1168_v58 = vsub.f32 %v1161_v54, %v1167_v57 }
0x1107   : > { %v1169_v59 = vmul.f32 %v1168_v58, %v1168_v58 }
0x1109   : > { %v1170_v60 = vsel %vm202_vm1, %v1169_v59, 0.0 }
0x110a   : > { %1171 = vadd.xlane.f32.xlu0 %v1170_v60 }
0x1197   : > { %v1172_v4 = vpop.xlane.xlu0 %1171 }
0x1198   : > { %v1173_v5 = vmul.f32 0.03125, %v1172_v4 }
0x119a   : > { %v1174_v6 = vadd.f32 1e-05, %v1173_v5 }
0x119c   : > { %2446 = vrsqrt.f32 %v1174_v6 }
0x11a6   : > { %v2447_v7 = vpop.eup %2446 }
0x11a7   : > { %v1176_v52 = vmul.f32 %v2447_v7, %v1168_v58 }
0x11a9   : > { %v1181_v11 = vmul.f32 %v2077_v8, %v1176_v52 }
0x11ab   : > { %v1186_v12 = vadd.f32 %v2078_v10, %v1181_v11  ;;  %v1246_v10 = vld [vmem:[%s3112_s2 + $0x1f8] sm:$0xff] }
0x11ad   : > { %v2894_v13 = vmul.f32 %v1186_v12, %v2687_v47 }
0x11af   : > { %v1192_v14 = vpack.c.bf16 %v2894_v13, %v2894_v13 }
0x11b1   : > { %2303 = vmatmul.mubr.msk.bf16.vlgmr.msra.gmra.mrb[24].mxu1 %vm202_vm1, %v1192_v14 }
0x11b2   : > { %2314 = vmatprep.mubr.msk.bf16.mxu1 %vm2475_vm0, %v2474_v3 }
0x1284   : > { %v1237_v16 = vpop.f32.mrb[24].mxu1 }
0x1285   : > { %v1238_v18 = vadd.f32 %v2079_v15, %v1237_v16  ;;  %v2304_v19 = vpop.f32.mrb[25].mxu1 }
0x1286   : > { %v1240_v20 = vpop.f32.mrb[26].mxu1 }
0x1287   : > { %v2904_v21 = vpack.c.bf16 %v1238_v18, %v1238_v18  ;;  %v2305_v23 = vpop.f32.mrb[27].mxu1 }
0x1288   : > { %v2081_v23 = vld [vmem:[%s3112_s2 + $0x200] ss:$0 sm:$0xff] }
0x1289   : > { %1255 = vrot.lane.b32.xlu0 %v2904_v21, %s2479_s6 }
0x128d   : > { %1419 = vrot.lane.b32.xlu0 %v2904_v21, %s2480_s7 }
0x1291   : > { %1417 = vrot.lane.b32.xlu0 %v2904_v21, %s2481_s9 }
0x12fb   : > { %v1256_v25 = vpop.permute.xlu0 %1255 }
0x12fc   : > { %v1261_v26 = vsel %vm510_vm4, %v1256_v25, 0  ;;  %v1252_v25 = vadd.f32 %v2081_v23, %v2894_v13  ;;  %v1620_v13 = vld [vmem:[%s3112_s2 + $0x220] sm:$0xff]  ;;  %v1614_v23 = vld [vmem:[%s2660_s14 + $0xa8] sm:$0xff] }
0x12fd   : > { %2307 = vmatpush3.bf16.xpose.msra.mxu0 %v1261_v26 }
0x12fe   : > { %2318 = vmatprep.subr.bf16.mxu0 %v2474_v3 }
0x12ff   : > { %v1420_v44 = vpop.permute.xlu0 %1419 }
0x1300   : > { %v1425_v46 = vsel %vm510_vm4, %v1420_v44, 0 }
0x1303   : > { %v1418_v48 = vpop.permute.xlu0 %1417 }
0x1304   : > { %2309 = vmatmul.mubr.msk.bf16.vlgmr.msra.gmra.mrb[28].mxu0 %vm510_vm4, %v2904_v21 }
0x1305   : > { %2320 = vmatprep.mubr.msk.bf16.mxu0 %vm2475_vm0, %v2474_v3  ;;  %2319 = vmatpush3.bf16.msra.mxu0 %v1372_v53 }
0x1306   : > { %2330 = vmatprep.subr.bf16.mxu0 %v2474_v3 }
0x13d7   : > { %v1297_v27 = vpop.f32.mrb[28].mxu0 }
0x13d8   : > { %v1303_v28 = vmul.f32 0.25, %v1297_v27  ;;  %v2310_v29 = vpop.f32.mrb[29].mxu0 }
0x13d9   : > { %v1300_v30 = vpop.f32.mrb[30].mxu0 }
0x13da   : > { %v2311_v31 = vpop.f32.mrb[31].mxu0  ;;  %v1304_v32 = vadd.f32 %v2715_v63, %v1303_v28 }
0x13dc   : > { %v1305_v33 = vsel %vm563_vm5, %v1304_v32, -inf }
0x13dd   : > { %1306 = vmax.xlane.f32.xlu1 %v1305_v33 }
0x146a   : > { %v1307_v34 = vpop.xlane.xlu1 %1306 }
0x146b   : > { %v1308_v35 = vsub.f32 %v1304_v32, %v1307_v34 }
0x146d   : > { %v1309_v36 = vmul.f32 1.442695, %v1308_v35 }
0x146f   : > { %2448 = vpow2.f32 %v1309_v36 }
0x1479   : > { %v2449_v37 = vpop.eup %2448 }
0x147a   : > { %v1311_v38 = vsel %vm563_vm5, %v2449_v37, 0.0 }
0x147b   : > { %1312 = vadd.xlane.f32.xlu1 %v1311_v38 }
0x148c   : > { %1323 = vrot.lane.b32.xlu1 %v2904_v21, %s2477_s8 }
0x1508   : > { %v1313_v39 = vpop.xlane.xlu1 %1312 }
0x1509   : > { %2450 = vrcp.f32 %v1313_v39  ;;  %v1621_v39 = vld [vmem:[%s3112_s2 + $0x228] sm:$0xff] }
0x150c   : > { %v1324_v40 = vpop.permute.xlu1 %1323 }
0x150d   : > { %v1329_v41 = vsel %vm587_vm6, %v1324_v40, 0  ;;  %v1622_v40 = vld [vmem:[%s3112_s2 + $0x230] sm:$0xff] }
0x150e   : > { %2313 = vmatpush3.bf16.msra.mxu1 %v1329_v41  ;;  %v1625_v41 = vpack.c.bf16 %v1622_v40, %v1621_v39 }
0x150f   : > { %2324 = vmatprep.subr.bf16.mxu1 %v2474_v3 }
0x1513   : > { %v2451_v42 = vpop.eup %2450 }
0x1514   : > { %v2925_v43 = vmul.f32 %v2451_v42, %v2449_v37  ;;  %v1619_v37 = vld [vmem:[%s3112_s2 + $0x218] sm:$0xff] }
0x1515   : > { %v1624_v38 = vpack.c.bf16 %v1620_v13, %v1619_v37 }
0x1516   : > { %v1322_v45 = vpack.c.bf16 %v2925_v43, %v2925_v43 }
0x1518   : > { %2315 = vmatmul.mubr.msk.bf16.vlgmr.msra.gmra.mrb[28].mxu1 %vm563_vm5, %v1322_v45 }
0x1519   : > { %2325 = vmatpush3.bf16.xpose.msra.mxu1 %v1425_v46  ;;  %2326 = vmatprep.mubr.msk.bf16.mxu1 %vm2475_vm0, %v2474_v3 }
0x151a   : > { %2342 = vmatprep.subr.bf16.mxu1 %v2474_v3 }
0x1520   : > { %2327 = vmatmul.mubr.msk.bf16.vlgmr.msra.gmra.mrb[32].mxu1 %vm510_vm4, %v1418_v48  ;;  %v2088_v48 = vld [vmem:[%s3112_s2 + $0x208] ss:$0 sm:$0xff] }
0x1521   : > { %2346 = vmatprep.mubr.msk.bf16.mxu1 %vm2475_vm0, %v2474_v3  ;;  %2343 = vmatpush3.bf16.msra.mxu1 %v1624_v38 }
0x1522   : > { %2344 = vmatprep.subr.bf16.mxu1 %v2474_v3 }
0x1525   : > { %2345 = vmatpush3.bf16.msra.mxu1 %v1625_v41 }
0x1526   : > { %2350 = vmatprep.subr.bf16.mxu1 %v2474_v3 }
0x15eb   : > { %v1365_v9 = vpop.f32.mrb[28].mxu1 }
0x15ec   : > { %v1371_v54 = vpack.c.bf16 %v1365_v9, %v1365_v9  ;;  %v2316_v55 = vpop.f32.mrb[29].mxu1 }
0x15ed   : > { %v1368_v56 = vpop.f32.mrb[30].mxu1 }
0x15ee   : > { %v2317_v57 = vpop.f32.mrb[31].mxu1  ;;  %2321 = vmatmul.mubr.msk.bf16.vlgmr.msra.gmra.mrb[32].mxu0 %vm510_vm4, %v1371_v54  ;;  %v2090_v56 = vld [vmem:[%s3112_s2 + $0x238] ss:$0 sm:$0xff] }
0x15ef   : > { %2332 = vmatprep.mubr.msk.bf16.mxu0 %vm2475_vm0, %v2474_v3 }
0x15f3   : > { %v1461_v58 = vpop.f32.mrb[32].mxu1 }
0x15f4   : > { %v1467_v59 = vmul.f32 0.25, %v1461_v58  ;;  %v2328_v60 = vpop.f32.mrb[33].mxu1 }
0x15f5   : > { %v1464_v61 = vpop.f32.mrb[34].mxu1 }
0x15f6   : > { %v2329_v62 = vpop.f32.mrb[35].mxu1  ;;  %v1468_v0 = vadd.f32 %v2715_v63, %v1467_v59  ;;  %v1245_v63 = vld [vmem:[%s3112_s2 + $0x1f0] sm:$0xff] }
0x15f7   : > { %v1536_v14 = vpack.c.bf16 %v1246_v10, %v1245_v63  ;;  %v1609_v10 = vld [vmem:[%s2660_s14 + $0x80] sm:$0xff] }
0x15f8   : > { %v1469_v24 = vsel %vm563_vm5, %v1468_v0, -inf }
0x15f9   : > { %1470 = vmax.xlane.f32.xlu1 %v1469_v24 }
0x1686   : > { %v1471_v1 = vpop.xlane.xlu1 %1470 }
0x1687   : > { %v1472_v2 = vsub.f32 %v1468_v0, %v1471_v1 }
0x1689   : > { %v1473_v4 = vmul.f32 1.442695, %v1472_v2 }
0x168b   : > { %2452 = vpow2.f32 %v1473_v4 }
0x1695   : > { %v2453_v5 = vpop.eup %2452 }
0x1696   : > { %v1475_v6 = vsel %vm563_vm5, %v2453_v5, 0.0 }
0x1697   : > { %1476 = vadd.xlane.f32.xlu0 %v1475_v6 }
0x16ad   : > { %1487 = vrot.lane.b32.xlu0 %v2904_v21, %s2482_s17 }
0x1724   : > { %v1477_v7 = vpop.xlane.xlu0 %1476 }
0x1725   : > { %2454 = vrcp.f32 %v1477_v7 }
0x1728   : > { %v1488_v8 = vpop.permute.xlu0 %1487 }
0x1729   : > { %v1493_v52 = vsel %vm587_vm6, %v1488_v8, 0  ;;  %v1607_v8 = vld [vmem:[%s2660_s14 + $0x70] sm:$0xff] }
0x172a   : > { %2331 = vmatpush3.bf16.msra.mxu0 %v1493_v52  ;;  %v1608_v52 = vld [vmem:[%s2660_s14 + $0x78] sm:$0xff] }
0x172b   : > { %2336 = vmatprep.subr.bf16.mxu0 %v2474_v3  ;;  %v1734_v63 = vpack.c.bf16 %v1608_v52, %v1607_v8 }
0x172f   : > { %v2455_v11 = vpop.eup %2454 }
0x1730   : > { %v2960_v12 = vmul.f32 %v2455_v11, %v2453_v5  ;;  %v1610_v11 = vld [vmem:[%s2660_s14 + $0x88] sm:$0xff] }
0x1732   : > { %v1486_v15 = vpack.c.bf16 %v2960_v12, %v2960_v12 }
0x1734   : > { %2333 = vmatmul.mubr.msk.bf16.vlgmr.msra.gmra.mrb[36].mxu0 %vm563_vm5, %v1486_v15  ;;  %v1611_v15 = vld [vmem:[%s2660_s14 + $0x90] sm:$0xff] }
0x1735   : > { %2337 = vmatpush3.bf16.msra.mxu0 %v1536_v14  ;;  %2338 = vmatprep.mubr.msk.bf16.mxu0 %vm2475_vm0, %v2474_v3  ;;  %v1735_v14 = vpack.c.bf16 %v1610_v11, %v1609_v10 }
0x1736   : > { %2364 = vmatprep.subr.bf16.mxu0 %v2474_v3 }
0x1807   : > { %v1529_v16 = vpop.f32.mrb[36].mxu0 }
0x1808   : > { %v1535_v18 = vpack.c.bf16 %v1529_v16, %v1529_v16  ;;  %v2334_v19 = vpop.f32.mrb[37].mxu0  ;;  %v1612_v16 = vld [vmem:[%s2660_s14 + $0x98] sm:$0xff] }
0x1809   : > { %v1532_v20 = vpop.f32.mrb[38].mxu0 }
0x180a   : > { %v2335_v21 = vpop.f32.mrb[39].mxu0  ;;  %2339 = vmatmul.mubr.msk.bf16.vlgmr.msra.gmra.mrb[32].mxu0 %vm510_vm4, %v1535_v18  ;;  %v1736_v18 = vpack.c.bf16 %v1612_v16, %v1611_v15 }
0x180b   : > { %2366 = vmatprep.mubr.msk.bf16.mxu0 %vm2475_vm0, %v2474_v3  ;;  %v1613_v21 = vld [vmem:[%s2660_s14 + $0xa0] sm:$0xff] }
0x18dd   : > { %v1574_v26 = vpop.f32.mrb[32].mxu0 }
0x18de   : > { %v2385_v27 = vadd.f32 %v1574_v26, %v1252_v25  ;;  %v2340_v28 = vpop.f32.mrb[33].mxu0  ;;  %v1737_v25 = vpack.c.bf16 %v1614_v23, %v1613_v21 }
0x18df   : > { %v1577_v29 = vpop.f32.mrb[34].mxu0 }
0x18e0   : > { %v2341_v30 = vpop.f32.mrb[35].mxu0  ;;  %v1583_v31 = vsel %vm202_vm1, %v2385_v27, 0.0 }
0x18e1   : > { %1584 = vadd.xlane.f32.xlu1 %v1583_v31 }
0x196e   : > { %v1585_v32 = vpop.xlane.xlu1 %1584 }
0x196f   : > { %v1586_v33 = vmul.f32 0.03125, %v1585_v32 }
0x1971   : > { %v1587_v34 = vsub.f32 %v2385_v27, %v1586_v33  ;;  %v1615_v27 = vld [vmem:[%s2660_s14 + $0xb0] sm:$0xff]  ;;  %v1617_v33 = vld [vmem:[%s2660_s14 + $0xc0] sm:$0xff] }
0x1972   : > { %v1738_v29 = vpack.c.bf16 %v1615_v27, %v1615_v27 }
0x1973   : > { %v1588_v35 = vmul.f32 %v1587_v34, %v1587_v34 }
0x1974   : > { %v1747_v31 = vsel %vm587_vm6, %v1738_v29, 0 }
0x1975   : > { %v1589_v36 = vsel %vm202_vm1, %v1588_v35, 0.0  ;;  %v1790_v35 = vpack.c.bf16 %v1617_v33, %v1617_v33 }
0x1976   : > { %1590 = vadd.xlane.f32.xlu1 %v1589_v36 }
0x1977   : > { %v1799_v37 = vsel %vm587_vm6, %v1790_v35, 0 }
0x1978   : > { %2365 = vmatpush3.bf16.msra.mxu0 %v1799_v37 }
0x1979   : > { %2370 = vmatprep.subr.bf16.mxu0 %v2474_v3 }
0x1a03   : > { %v1591_v42 = vpop.xlane.xlu1 %1590 }
0x1a04   : > { %v1592_v44 = vmul.f32 0.03125, %v1591_v42 }
0x1a06   : > { %v1593_v45 = vadd.f32 1e-05, %v1592_v44 }
0x1a08   : > { %2456 = vrsqrt.f32 %v1593_v45 }
0x1a12   : > { %v2457_v46 = vpop.eup %2456 }
0x1a13   : > { %v1595_v50 = vmul.f32 %v2457_v46, %v1587_v34 }
0x1a15   : > { %v1600_v53 = vmul.f32 %v2088_v48, %v1595_v50 }
0x1a17   : > { %v1605_v9 = vadd.f32 %v2089_v51, %v1600_v53 }
0x1a19   : > { %v2998_v54 = vmul.f32 %v1605_v9, %v2687_v47 }
0x1a1b   : > { %v1623_v55 = vpack.c.bf16 %v2998_v54, %v2998_v54 }
0x1a1d   : > { %2347 = vmatmul.mubr.msk.bf16.vlgmr.msra.gmra.mrb[36].mxu1 %vm202_vm1, %v1623_v55 }
0x1a1e   : > { %2360 = vmatprep.mubr.msk.bf16.mxu1 %vm2475_vm0, %v2474_v3  ;;  %2351 = vmatpush3.bf16.msra.mxu1 %v1734_v63 }
0x1a1f   : > { %2352 = vmatprep.subr.bf16.mxu1 %v2474_v3 }
0x1a22   : > { %2353 = vmatpush3.bf16.msra.mxu1 %v1735_v14  ;;  %v2096_v14 = vld [vmem:[%s3112_s2 + $0x248] ss:$0 sm:$0xff] }
0x1a23   : > { %2354 = vmatprep.subr.bf16.mxu1 %v2474_v3 }
0x1a26   : > { %2355 = vmatpush3.bf16.msra.mxu1 %v1736_v18 }
0x1a27   : > { %2356 = vmatprep.subr.bf16.mxu1 %v2474_v3 }
0x1a2a   : > { %2357 = vmatpush3.bf16.msra.mxu1 %v1737_v25 }
0x1a2b   : > { %2358 = vmatprep.subr.bf16.mxu1 %v2474_v3 }
0x1a2e   : > { %2359 = vmatpush3.bf16.msra.mxu1 %v1747_v31  ;;  %v1924_v31 = vld [vmem:[%s3112_s2 + $0x270] sm:$0xff] }
0x1af0   : > { %v1668_v57 = vpop.f32.mrb[36].mxu1 }
0x1af1   : > { %v1669_v58 = vadd.f32 %v2090_v56, %v1668_v57  ;;  %v2348_v59 = vpop.f32.mrb[37].mxu1 }
0x1af2   : > { %v1671_v60 = vpop.f32.mrb[38].mxu1 }
0x1af3   : > { %v1674_v61 = vand.u32 2147483647, %v1669_v58  ;;  %v2349_v62 = vpop.f32.mrb[39].mxu1  ;;  %v1681_v6 = vmax.f32 %v1669_v58, 0.0  ;;  %v1841_v60 = vld [vmem:[%s3112_s2 + $0x240] sm:$0xff] }
0x1af4   : > { %v1843_v62 = vpack.c.bf16 %v1841_v60, %v1841_v60 }
0x1af5   : > { %v1675_v0 = vsub.f32 0.0, %v1674_v61  ;;  %v2092_v61 = vld [vmem:[%s2660_s14 + $0xb8] ss:$0 sm:$0xff] }
0x1af7   : > { %v1676_v24 = vmul.f32 1.442695, %v1675_v0 }
0x1af9   : > { %2458 = vpow2.f32 %v1676_v24 }
0x1b03   : > { %v2459_v1 = vpop.eup %2458 }
0x1b04   : > { %v1678_v2 = vadd.f32 1.0, %v2459_v1 }
0x1b06   : > { %2460 = vlog2.f32 %v1678_v2 }
0x1b10   : > { %v2461_v4 = vpop.eup %2460 }
0x1b11   : > { %v1680_v5 = vmul.f32 0.6931472, %v2461_v4 }
0x1b13   : > { %v1682_v7 = vadd.f32 %v1681_v6, %v1680_v5  ;;  %v1853_v6 = vsel %vm587_vm6, %v1843_v62, 0 }
0x1b15   : > { %2462 = vtanh.f32 %v1682_v7 }
0x1b1f   : > { %v2463_v19 = vpop.eup %2462 }
0x1b20   : > { %v1684_v20 = vmul.f32 %v2463_v19, %v1669_v58 }
0x1b22   : > { %1705 = vrot.lane.b32.xlu1 %v1684_v20, %s2476_s30  ;;  %v1687_v26 = vrot.slane %v1684_v20, 6  ;;  %v1686_v28 = vrot.slane %v1684_v20, 5  ;;  %v1688_v30 = vrot.slane %v1684_v20, 7  ;;  %v1690_v32 = vrot.slane %v1684_v20, 2 }
0x1b23   : > { %v1689_v34 = vrot.slane %v1684_v20, 1  ;;  %v1685_v36 = vrot.slane %v1684_v20, 4  ;;  %v1691_v13 = vrot.slane %v1684_v20, 3 }
0x1b24   : > { %1697 = vrot.lane.b32.xlu0 %v1687_v26, %s2484_s23 }
0x1b26   : > { %1693 = vrot.lane.b32.xlu1 %v1686_v28, %s2483_s21 }
0x1b28   : > { %1701 = vrot.lane.b32.xlu0 %v1688_v30, %s2486_s25 }
0x1b2a   : > { %1713 = vrot.lane.b32.xlu1 %v1690_v32, %s2482_s17 }
0x1b2c   : > { %1709 = vrot.lane.b32.xlu0 %v1689_v34, %s2485_s24 }
0x1b2e   : > { %1721 = vrot.lane.b32.xlu1 %v1685_v36, %s2477_s8 }
0x1b30   : > { %1717 = vrot.lane.b32.xlu0 %v1691_v13, %s2487_s26 }
0x1b94   : > { %v1706_v38 = vpop.permute.xlu1 %1705 }
0x1b96   : > { %v1698_v39 = vpop.permute.xlu0 %1697 }
0x1b98   : > { %v1694_v40 = vpop.permute.xlu1 %1693 }
0x1b99   : > { %v1724_v41 = vsel %vm563_vm5, %v1685_v36, %v1694_v40 }
0x1b9a   : > { %v1702_v42 = vpop.permute.xlu0 %1701  ;;  %v1725_v44 = vsel %vm510_vm4, %v1724_v41, %v1698_v39  ;;  %v2099_v39 = vld [vmem:[%s3112_s2 + $0x258] ss:$0 sm:$0xff] }
0x1b9b   : > { %v1726_v45 = vsel %vm987_vm7, %v1725_v44, %v1702_v42 }
0x1b9c   : > { %v1714_v46 = vpop.permute.xlu1 %1713  ;;  %v1727_v50 = vsel %vm202_vm1, %v1726_v45, %v1706_v38  ;;  %v2100_v45 = vld [vmem:[%s3112_s2 + $0x280] ss:$0 sm:$0xff] }
0x1b9e   : > { %v1710_v48 = vpop.permute.xlu0 %1709 }
0x1b9f   : > { %v1728_v51 = vsel %vm990_vm8, %v1727_v50, %v1710_v48 }
0x1ba0   : > { %v1729_v9 = vsel %vm992_vm9, %v1728_v51, %v1714_v46  ;;  %v1722_v55 = vpop.permute.xlu1 %1721 }
0x1ba2   : > { %v1718_v53 = vpop.permute.xlu0 %1717 }
0x1ba3   : > { %v1730_v56 = vsel %vm994_vm10, %v1729_v9, %v1718_v53 }
0x1ba4   : > { %v1731_v57 = vsel %vm204_vm2, %v1730_v56, %v1722_v55 }
0x1ba5   : > { %v1732_v58 = vmul.f32 %v1731_v57, %v2846_v22  ;;  %v2094_v22 = vld [vmem:[%s2660_s14 + $0xc8] ss:$0 sm:$0xff] }
0x1ba7   : > { %v1733_v59 = vpack.c.bf16 %v1732_v58, %v1732_v58 }
0x1ba9   : > { %2361 = vmatmul.mubr.msk.bf16.vlgmr.msra.gmra.mrb[40].mxu1 %vm1008_vm11, %v1733_v59 }
0x1c7c   : > { %v1783_v0 = vpop.f32.mrb[40].mxu1 }
0x1c7d   : > { %v1784_v24 = vadd.f32 %v2092_v61, %v1783_v0  ;;  %v2362_v1 = vpop.f32.mrb[41].mxu1 }
0x1c7e   : > { %v1786_v2 = vpop.f32.mrb[42].mxu1 }
0x1c7f   : > { %v1789_v4 = vpack.c.bf16 %v1784_v24, %v1784_v24  ;;  %v2363_v5 = vpop.f32.mrb[43].mxu1 }
0x1c81   : > { %2367 = vmatmul.mubr.msk.bf16.vlgmr.msra.gmra.mrb[40].mxu0 %vm563_vm5, %v1789_v4 }
0x1c82   : > { %2371 = vmatpush3.bf16.msra.mxu0 %v1853_v6  ;;  %2372 = vmatprep.mubr.msk.bf16.mxu0 %vm2475_vm0, %v2474_v3 }
0x1c83   : > { %2376 = vmatprep.subr.bf16.mxu0 %v2474_v3 }
0x1d54   : > { %v1835_v7 = vpop.f32.mrb[40].mxu0 }
0x1d55   : > { %v1836_v8 = vadd.f32 %v2094_v22, %v1835_v7  ;;  %v2368_v52 = vpop.f32.mrb[41].mxu0 }
0x1d56   : > { %v1838_v63 = vpop.f32.mrb[42].mxu0 }
0x1d57   : > { %v1842_v10 = vpack.c.bf16 %v1836_v8, %v1836_v8  ;;  %v2369_v11 = vpop.f32.mrb[43].mxu0 }
0x1d59   : > { %2373 = vmatmul.mubr.msk.bf16.vlgmr.msra.gmra.mrb[44].mxu0 %vm563_vm5, %v1842_v10 }
0x1d5a   : > { %2380 = vmatprep.mubr.msk.bf16.mxu0 %vm2475_vm0, %v2474_v3 }
0x1e2c   : > { %v1889_v15 = vpop.f32.mrb[44].mxu0 }
0x1e2d   : > { %v1890_v16 = vadd.f32 %v2096_v14, %v1889_v15  ;;  %v2374_v18 = vpop.f32.mrb[45].mxu0 }
0x1e2e   : > { %v1892_v19 = vpop.f32.mrb[46].mxu0 }
0x1e2f   : > { %v2375_v20 = vpop.f32.mrb[47].mxu0  ;;  %v1895_v21 = vadd.f32 %v1890_v16, %v2998_v54 }
0x1e31   : > { %v1898_v23 = vsel %vm202_vm1, %v1895_v21, 0.0 }
0x1e32   : > { %1899 = vadd.xlane.f32.xlu0 %v1898_v23 }
0x1e48   : > { %576 = vrot.lane.b32.xlu0 %v2728_v17, %s2476_s30  ;;  %v1922_v17 = vld [vmem:[%s3112_s2 + $0x260] sm:$0xff] }
0x1e4c   : > { %1317 = vrot.lane.b32.xlu0 %v2925_v43, %s2482_s17  ;;  %v1923_v43 = vld [vmem:[%s3112_s2 + $0x268] sm:$0xff] }
0x1e4d   : > { %v1927_v30 = vpack.c.bf16 %v1923_v43, %v1922_v17 }
0x1e4f   : > { %2377 = vmatpush3.bf16.msra.mxu0 %v1927_v30 }
0x1e50   : > { %2378 = vmatprep.subr.bf16.mxu0 %v2474_v3  ;;  %v2098_v3 = vld [vmem:[%s3112_s2 + $0x250] ss:$0 sm:$0xff] }
0x1ebf   : > { %v1900_v25 = vpop.xlane.xlu0 %1899 }
0x1ec0   : > { %v1901_v26 = vmul.f32 0.03125, %v1900_v25 }
0x1ec2   : > { %v1902_v54 = vsub.f32 %v1895_v21, %v1901_v26 }
0x1ec3   : > { %v577_v27 = vpop.permute.xlu0 %576 }
0x1ec4   : > { %580 = vst.msk [vmem:[%s3070_s4] sm:$0xff] %vm579_vm12, %v577_v27  ;;  %v1903_v28 = vmul.f32 %v1902_v54, %v1902_v54 }
0x1ec6   : > { %v1904_v29 = vsel %vm202_vm1, %v1903_v28, 0.0 }
0x1ec7   : > { %1905 = vadd.xlane.f32.xlu1 %v1904_v29  ;;  %v1318_v36 = vpop.permute.xlu0 %1317 }
0x1ed8   : > { %741 = vrot.lane.b32.xlu1 %v2763_v49, %s2485_s24  ;;  %v1925_v49 = vld [vmem:[%s3112_s2 + $0x278] sm:$0xff] }
0x1edc   : > { %1481 = vrot.lane.b32.xlu1 %v2960_v12, %s2487_s26  ;;  %v1928_v12 = vpack.c.bf16 %v1925_v49, %v1924_v31 }
0x1ede   : > { %2379 = vmatpush3.bf16.msra.mxu0 %v1928_v12 }
0x1f54   : > { %v1906_v32 = vpop.xlane.xlu1 %1905 }
0x1f55   : > { %v1907_v33 = vmul.f32 0.03125, %v1906_v32 }
0x1f57   : > { %v1908_v34 = vadd.f32 1e-05, %v1907_v33 }
0x1f58   : > { %v742_v35 = vpop.permute.xlu1 %741 }
0x1f59   : > { %2464 = vrsqrt.f32 %v1908_v34  ;;  %745 = vst.msk [vmem:[%s3070_s4] sm:$0xff] %vm744_vm13, %v742_v35 }
0x1f5a   : > { %1321 = vst.msk [vmem:[%s3070_s4] sm:$0xff] %vm1320_vm14, %v1318_v36 }
0x1f5c   : > { %v1482_v37 = vpop.permute.xlu1 %1481 }
0x1f5d   : > { %1485 = vst.msk [vmem:[%s3070_s4] sm:$0xff] %vm1484_vm15, %v1482_v37 }
0x1f63   : > { %v2465_v13 = vpop.eup %2464 }
0x1f64   : > { %v1910_v38 = vmul.f32 %v2465_v13, %v1902_v54 }
0x1f66   : > { %v1915_v40 = vmul.f32 %v2098_v3, %v1910_v38 }
0x1f68   : > { %v1920_v41 = vadd.f32 %v2099_v39, %v1915_v40 }
0x1f6a   : > { %v1921_v42 = vmul.f32 %v1920_v41, %v2687_v47 }
0x1f6c   : > { %v1926_v44 = vpack.c.bf16 %v1921_v42, %v1921_v42 }
0x1f6e   : > { %2381 = vmatmul.mubr.msk.bf16.vlgmr.msra.gmra.mrb[48].mxu0 %vm202_vm1, %v1926_v44 }
0x2041   : > { %v1971_v46 = vpop.f32.mrb[48].mxu0 }
0x2042   : > { %v1972_v48 = vadd.f32 %v2100_v45, %v1971_v46  ;;  %v2382_v50 = vpop.f32.mrb[49].mxu0 }
0x2043   : > { %v1974_v51 = vpop.f32.mrb[50].mxu0 }
0x2044   : > { %1977 = vst.msk [vmem:[%s3070_s4] sm:$0xff] %vm202_vm1, %v1972_v48  ;;  %v2383_v53 = vpop.f32.mrb[51].mxu0 }
0x2045 PF: > { %s13_s12 = sadd.s32 1, %s2472_s12  }
0x2046   : > { %p10_p4 = scmp.ge.s32.totalorder %s13_s12, 4  }
0x2048   :  { %12 = sbr.rel (!%p10_p4) target bundleno = 1 (0x1), region = 65 }

</bundles_post_ra>
